<compile_context>
chip_gen: v7x
topology: tpu7x:2x2x1
jax: 0.10.0
libtpu: 0.0.40
codegen_flags: <defaults>
</compile_context>

<pallas_src>
import functools
import math

import jax
import jax.numpy as jnp
from jax import lax
from jax.experimental import pallas as pl
from jax.experimental.pallas import tpu as pltpu

# ---------------- small synthetic Qwen3 config ----------------
HIDDEN = 128          # config.hidden_size
N_HEADS = 4           # config.num_attention_heads
N_KV_HEADS = 2        # config.num_key_value_heads
HEAD_DIM = 32         # config.head_dim
INTER = 256           # config.intermediate_size
N_LAYERS = 2          # config.num_hidden_layers
VOCAB = 256           # config.vocab_size
PAD_ID = 0            # config.pad_token_id
EPS = 1e-6            # config.rms_norm_eps
ROPE_THETA = 10000.0  # config.rope_theta
SEQ = 16              # number of tokens (flattened)
DTYPE = jnp.float32   # activation / IO dtype
WDTYPE = jnp.bfloat16 # weight storage dtype (native MXU input rate)

DQ = N_HEADS * HEAD_DIM
DKV = N_KV_HEADS * HEAD_DIM
QKV_OUT = (N_HEADS + 2 * N_KV_HEADS) * HEAD_DIM

# Explicit scoped-VMEM budget, safe on v5e/v6e/v7x.  Actual per-layer working set here
# is <2 MiB; at real Qwen3 dims raise this (v5e/v6e) and re-derive weight tiling (v7x).
_VMEM_LIMIT = 32 * 1024 * 1024


# ============================ fused decoder-stack kernel ============================

def _qwen3_stack_kernel(x_ref, cos_ref, sin_ref, bq_ref, bk_ref, rq_ref, rk_ref,
                        fnorm_ref, ln_ref, qkvw_ref, qn_ref, kn_ref, ow_ref,
                        pln_ref, guw_ref, dw_ref,
                        out_ref, x_sc, res_sc,
                        *, eps, scale, n_heads, n_kv_heads, head_dim, inter, seq):
    """One grid step == one full decoder layer (attn block + MLP block).

    Carried state across the layer grid axis lives in VMEM scratch:
      x_sc   : current block output (mlp_out of previous layer)
      res_sc : residual stream
    The final RMSNorm is fused into the last grid step.
    """
    f32 = jnp.float32
    bf16 = jnp.bfloat16
    layer = pl.program_id(0)
    dq = n_heads * head_dim
    dkv = n_kv_heads * head_dim
    group = n_heads // n_kv_heads

    # ---- layer 0 bootstrap: residual := embeddings (PyTorch: residual = hidden) ----
    @pl.when(layer == 0)
    def _():
        res_sc[...] = x_ref[...].astype(f32)
        x_sc[...] = jnp.zeros_like(x_sc)

    def add_rmsnorm(a, b, w):
        h_res = a + b
        var = jnp.mean(h_res * h_res, axis=-1, keepdims=True)
        return h_res, h_res * lax.rsqrt(var + eps) * w.astype(f32)

    # ======================= attention block =======================
    h_res, h = add_rmsnorm(x_sc[...], res_sc[...], ln_ref[...])        # [T, H] f32

    # qkv projection, bf16 inputs / f32 accumulation (heads packed along lanes)
    qkv = jnp.dot(h.astype(bf16), qkvw_ref[...],
                  preferred_element_type=f32)                          # [T, Dq+2*Dkv]
    q = qkv[:, :dq]
    k = qkv[:, dq:dq + dkv]
    v = qkv[:, dq + dkv:]

    # per-head RMSNorm via block-diagonal ones matmul (f32, stays lane-dense)
    inv_d = 1.0 / head_dim
    q_ms = jnp.dot(q * q, bq_ref[...], preferred_element_type=f32) * inv_d
    q = q * lax.rsqrt(q_ms + eps) * qn_ref[...].astype(f32)
    k_ms = jnp.dot(k * k, bk_ref[...], preferred_element_type=f32) * inv_d
    k = k * lax.rsqrt(k_ms + eps) * kn_ref[...].astype(f32)

    # RoPE: rotate_half expressed as per-head block-diagonal +/-1 rotation matmul (f32)
    cos_q = cos_ref[...]
    sin_q = sin_ref[...]
    q = q * cos_q + jnp.dot(q, rq_ref[...], preferred_element_type=f32) * sin_q
    k = (k * cos_q[:, :dkv]
         + jnp.dot(k, rk_ref[...], preferred_element_type=f32) * sin_q[:, :dkv])
    q = q * scale

    # causal GQA attention: per kv-head, its `group` query heads stacked along rows
    tok = lax.broadcasted_iota(jnp.int32, (group * seq, seq), 0) % seq
    col = lax.broadcasted_iota(jnp.int32, (group * seq, seq), 1)
    causal = col <= tok
    neg = jnp.float32(-1e30)       # mask / softmax math always f32 in-kernel

    o_parts = []
    for kvh in range(n_kv_heads):                                      # static unroll
        k_h = k[:, kvh * head_dim:(kvh + 1) * head_dim].astype(bf16)
        v_h = v[:, kvh * head_dim:(kvh + 1) * head_dim].astype(bf16)
        q_grp = jnp.concatenate(
            [q[:, (kvh * group + g) * head_dim:(kvh * group + g + 1) * head_dim]
             for g in range(group)], axis=0)                           # [group*T, D]
        s = lax.dot_general(q_grp.astype(bf16), k_h, (((1,), (1,)), ((), ())),
                            preferred_element_type=f32)                # [group*T, T] f32
        s = jnp.where(causal, s, neg)
        m = jnp.max(s, axis=-1, keepdims=True)
        p = jnp.exp(s - m)
        denom = jnp.sum(p, axis=-1, keepdims=True)
        p = p * pl.reciprocal(denom, approx=True)                      # EUP reciprocal
        o_grp = jnp.dot(p.astype(bf16), v_h, preferred_element_type=f32)  # [group*T, D]
        for g in range(group):
            o_parts.append(o_grp[g * seq:(g + 1) * seq, :])            # head order 0..n-1

    o_all = jnp.concatenate(o_parts, axis=-1)                          # [T, DQ] lane-dense
    attn_out = jnp.dot(o_all.astype(bf16), ow_ref[...],
                       preferred_element_type=f32)                     # ONE K=DQ o_proj

    # ======================= MLP block =======================
    h_res2, h2 = add_rmsnorm(attn_out, h_res, pln_ref[...])

    gu = jnp.dot(h2.astype(bf16), guw_ref[...], preferred_element_type=f32)  # [T, 2I]
    gate = gu[:, :inter]
    up = gu[:, inter:]
    act = gate * jax.nn.sigmoid(gate) * up                             # SiLU(gate)*up
    mlp_out = jnp.dot(act.astype(bf16), dw_ref[...], preferred_element_type=f32)

    # carry to next layer
    x_sc[...] = mlp_out
    res_sc[...] = h_res2

    # ======================= final norm (last layer only) =======================
    @pl.when(layer == pl.num_programs(0) - 1)
    def _():
        _, h_fin = add_rmsnorm(mlp_out, h_res2, fnorm_ref[...])
        out_ref[...] = h_fin.astype(out_ref.dtype)


# ============================ wrapper ============================

def qwen3_stack(x, cos_t, sin_t, params):
    """Run the whole decoder stack (+ final norm) in one pallas_call."""
    T, H = x.shape
    kern = functools.partial(
        _qwen3_stack_kernel, eps=EPS, scale=1.0 / math.sqrt(HEAD_DIM),
        n_heads=N_HEADS, n_kv_heads=N_KV_HEADS, head_dim=HEAD_DIM,
        inter=INTER, seq=T)

    def res_spec(shape):       # constant / shared across layers: DMA'd once, stays resident
        return pl.BlockSpec(shape, lambda l: (0,) * len(shape))

    def layer_spec(shape):     # stacked per-layer weights: auto-pipelined over the layer axis
        return pl.BlockSpec((None,) + shape, lambda l: (l,) + (0,) * len(shape))

    grid_spec = pltpu.PrefetchScalarGridSpec(
        num_scalar_prefetch=0,
        grid=(N_LAYERS,),
        in_specs=[
            res_spec((T, H)),              # token embeddings
            res_spec((T, DQ)),             # cos (head-tiled)
            res_spec((T, DQ)),             # sin (head-tiled)
            res_spec((DQ, DQ)),            # block-diag ones (q per-head mean-square)
            res_spec((DKV, DKV)),          # block-diag ones (k per-head mean-square)
            res_spec((DQ, DQ)),            # rotate_half matrix (q)
            res_spec((DKV, DKV)),          # rotate_half matrix (k)
            res_spec((1, H)),              # final norm weight
            layer_spec((1, H)),            # input_layernorm
            layer_spec((H, QKV_OUT)),      # qkv_proj (bf16)
            layer_spec((1, DQ)),           # q_norm (pre-tiled per head)
            layer_spec((1, DKV)),          # k_norm (pre-tiled per head)
            layer_spec((DQ, H)),           # o_proj (bf16)
            layer_spec((1, H)),            # post_attention_layernorm
            layer_spec((H, 2 * INTER)),    # gate_up_proj (bf16)
            layer_spec((INTER, H)),        # down_proj (bf16)
        ],
        out_specs=pl.BlockSpec((T, H), lambda l: (0, 0)),   # resident, written at last layer
        scratch_shapes=[pltpu.VMEM((T, H), jnp.float32),    # x carry
                        pltpu.VMEM((T, H), jnp.float32)],   # residual carry
    )

    return pl.pallas_call(
        kern,
        out_shape=jax.ShapeDtypeStruct((T, H), x.dtype),
        grid_spec=grid_spec,
        compiler_params=pltpu.CompilerParams(
            dimension_semantics=("arbitrary",),   # layers are sequential (carried state)
            vmem_limit_bytes=_VMEM_LIMIT),
    )(x, cos_t, sin_t,
      params["bq"], params["bk"], params["rq"], params["rk"],
      params["final_norm"],
      params["input_ln"], params["qkv_w"], params["q_norm_t"], params["k_norm_t"],
      params["o_w"], params["post_ln"], params["gate_up_w"], params["down_w"])


# ============================ model glue ============================

def rope_cos_sin(position_ids):
    inv_freq = 1.0 / (ROPE_THETA ** (jnp.arange(0, HEAD_DIM, 2, dtype=jnp.float32)
                                     / HEAD_DIM))
    freqs = position_ids.astype(jnp.float32)[:, None] * inv_freq[None, :]
    emb = jnp.concatenate([freqs, freqs], axis=-1)        # [T, HEAD_DIM]
    return jnp.cos(emb).astype(jnp.float32), jnp.sin(emb).astype(jnp.float32)


def _blockdiag_ones(n_heads, d):
    """Block-diagonal all-ones matrix: per-head segmented sum as one matmul."""
    return jnp.kron(jnp.eye(n_heads, dtype=jnp.float32),
                    jnp.ones((d, d), jnp.float32))


def _rotate_half_matrix(n_heads, d):
    """Block-diagonal matrix R s.t. x @ R == rotate_half(x) per packed head."""
    half = d // 2
    r = jnp.zeros((d, d), jnp.float32)
    r = r.at[:half, half:].set(jnp.eye(half, dtype=jnp.float32))
    r = r.at[half:, :half].set(-jnp.eye(half, dtype=jnp.float32))
    return jnp.kron(jnp.eye(n_heads, dtype=jnp.float32), r)


def init_params(key):
    def nrm(k, shape, dtype):
        return (0.02 * jax.random.normal(k, shape, dtype=jnp.float32)).astype(dtype)

    keys = jax.random.split(key, 1 + N_LAYERS)
    embed = nrm(keys[0], (VOCAB, HIDDEN), DTYPE)
    embed = embed.at[PAD_ID].set(0.0)   # nn.Embedding padding_idx row is zeroed

    qkv_w, o_w, gate_up_w, down_w = [], [], [], []
    input_ln, post_ln, q_norm_t, k_norm_t = [], [], [], []
    for li in range(N_LAYERS):
        k0, k1, k2, k3 = jax.random.split(keys[1 + li], 4)
        qkv_w.append(nrm(k0, (HIDDEN, QKV_OUT), WDTYPE))
        o_w.append(nrm(k1, (DQ, HIDDEN), WDTYPE))
        gate_up_w.append(nrm(k2, (HIDDEN, 2 * INTER), WDTYPE))
        down_w.append(nrm(k3, (INTER, HIDDEN), WDTYPE))
        input_ln.append(jnp.ones((1, HIDDEN), jnp.float32))
        post_ln.append(jnp.ones((1, HIDDEN), jnp.float32))
        # q_norm/k_norm are [HEAD_DIM]; pre-tile per head -> lane-dense [1, DQ]/[1, DKV]
        q_norm_t.append(jnp.tile(jnp.ones((HEAD_DIM,), jnp.float32), N_HEADS).reshape(1, DQ))
        k_norm_t.append(jnp.tile(jnp.ones((HEAD_DIM,), jnp.float32), N_KV_HEADS).reshape(1, DKV))

    return {
        "embed": embed,
        "final_norm": jnp.ones((1, HIDDEN), jnp.float32),
        "qkv_w": jnp.stack(qkv_w),            # [L, H, QKV_OUT] bf16
        "o_w": jnp.stack(o_w),                # [L, DQ, H]      bf16
        "gate_up_w": jnp.stack(gate_up_w),    # [L, H, 2I]      bf16
        "down_w": jnp.stack(down_w),          # [L, I, H]       bf16
        "input_ln": jnp.stack(input_ln),      # [L, 1, H]       f32
        "post_ln": jnp.stack(post_ln),        # [L, 1, H]       f32
        "q_norm_t": jnp.stack(q_norm_t),      # [L, 1, DQ]      f32
        "k_norm_t": jnp.stack(k_norm_t),      # [L, 1, DKV]     f32
        # constant lane-dense MXU helper matrices (segmented mean-square / rotate_half)
        "bq": _blockdiag_ones(N_HEADS, HEAD_DIM),
        "bk": _blockdiag_ones(N_KV_HEADS, HEAD_DIM),
        "rq": _rotate_half_matrix(N_HEADS, HEAD_DIM),
        "rk": _rotate_half_matrix(N_KV_HEADS, HEAD_DIM),
    }


def qwen3_forward(params, input_ids, position_ids):
    # embed_tokens (gather is XLA glue outside the kernel)
    x = params["embed"][input_ids]                        # [T, H]
    # rotary table, tiled so all heads fold into the 128-wide lane axis
    cos, sin = rope_cos_sin(position_ids)                 # [T, HEAD_DIM]
    cos_t = jnp.tile(cos, (1, N_HEADS))                   # [T, DQ]
    sin_t = jnp.tile(sin, (1, N_HEADS))
    return qwen3_stack(x, cos_t, sin_t, params)


if __name__ == "__main__":
    root = jax.random.PRNGKey(0)
    k_params, k_ids = jax.random.split(root)

    params = init_params(k_params)
    input_ids = jax.random.randint(k_ids, (SEQ,), 1, VOCAB, dtype=jnp.int32)
    position_ids = jnp.arange(SEQ, dtype=jnp.int32)

    fwd = jax.jit(qwen3_forward)
    out = fwd(params, input_ids, position_ids)
    out = jax.block_until_ready(out)

    assert out.shape == (SEQ, HIDDEN)
    assert out.dtype == DTYPE
    assert bool(jnp.all(jnp.isfinite(out)))
    print("KERNEL_OK")
</pallas_src>

<mosaic_0001>
module attributes {stable_mosaic.version = 11 : i64} {
  func.func @_qwen3_stack_kernel(%arg0: i32, %arg1: memref<16x128xf32, #tpu.memory_space<vmem>>, %arg2: memref<16x128xf32, #tpu.memory_space<vmem>>, %arg3: memref<16x128xf32, #tpu.memory_space<vmem>>, %arg4: memref<128x128xf32, #tpu.memory_space<vmem>>, %arg5: memref<64x64xf32, #tpu.memory_space<vmem>>, %arg6: memref<128x128xf32, #tpu.memory_space<vmem>>, %arg7: memref<64x64xf32, #tpu.memory_space<vmem>>, %arg8: memref<1x128xf32, #tpu.memory_space<vmem>>, %arg9: memref<1x1x128xf32, #tpu.memory_space<vmem>>, %arg10: memref<1x128x256xbf16, #tpu.memory_space<vmem>>, %arg11: memref<1x1x128xf32, #tpu.memory_space<vmem>>, %arg12: memref<1x1x64xf32, #tpu.memory_space<vmem>>, %arg13: memref<1x128x128xbf16, #tpu.memory_space<vmem>>, %arg14: memref<1x1x128xf32, #tpu.memory_space<vmem>>, %arg15: memref<1x128x512xbf16, #tpu.memory_space<vmem>>, %arg16: memref<1x256x128xbf16, #tpu.memory_space<vmem>>, %arg17: memref<16x128xf32, #tpu.memory_space<vmem>>, %arg18: memref<16x128xf32, #tpu.memory_space<vmem>>, %arg19: memref<16x128xf32, #tpu.memory_space<vmem>>) attributes {dimension_semantics = [#tpu.dimension_semantics<arbitrary>], iteration_bounds = array<i64: 2>, scalar_prefetch = 0 : i64, scratch_operands = 2 : i64, tpu.core_type = #tpu.core_type<tc>, window_params = [{pipeline_mode = #tpu.pipeline_mode<synchronous>, transform_indices = @transform_0, window_bounds = array<i64: 16, 128>}, {pipeline_mode = #tpu.pipeline_mode<synchronous>, transform_indices = @transform_1, window_bounds = array<i64: 16, 128>}, {pipeline_mode = #tpu.pipeline_mode<synchronous>, transform_indices = @transform_2, window_bounds = array<i64: 16, 128>}, {pipeline_mode = #tpu.pipeline_mode<synchronous>, transform_indices = @transform_3, window_bounds = array<i64: 128, 128>}, {pipeline_mode = #tpu.pipeline_mode<synchronous>, transform_indices = @transform_4, window_bounds = array<i64: 64, 64>}, {pipeline_mode = #tpu.pipeline_mode<synchronous>, transform_indices = @transform_5, window_bounds = array<i64: 128, 128>}, {pipeline_mode = #tpu.pipeline_mode<synchronous>, transform_indices = @transform_6, window_bounds = array<i64: 64, 64>}, {pipeline_mode = #tpu.pipeline_mode<synchronous>, transform_indices = @transform_7, window_bounds = array<i64: 1, 128>}, {transform_indices = @transform_8, window_bounds = array<i64: 1, 1, 128>}, {transform_indices = @transform_9, window_bounds = array<i64: 1, 128, 256>}, {transform_indices = @transform_10, window_bounds = array<i64: 1, 1, 128>}, {transform_indices = @transform_11, window_bounds = array<i64: 1, 1, 64>}, {transform_indices = @transform_12, window_bounds = array<i64: 1, 128, 128>}, {transform_indices = @transform_13, window_bounds = array<i64: 1, 1, 128>}, {transform_indices = @transform_14, window_bounds = array<i64: 1, 128, 512>}, {transform_indices = @transform_15, window_bounds = array<i64: 1, 256, 128>}, {pipeline_mode = #tpu.pipeline_mode<synchronous>, transform_indices = @transform_16, window_bounds = array<i64: 16, 128>}]} {
    %c0_i32 = arith.constant 0 : i32
    %0 = arith.cmpi eq, %arg0, %c0_i32 : i32
    %1 = arith.extui %0 : i1 to i32
    %c0_i32_0 = arith.constant 0 : i32
    %2 = arith.cmpi ne, %1, %c0_i32_0 : i32
    scf.if %2 {
      %c0_79 = arith.constant 0 : index
      %c0_80 = arith.constant 0 : index
      %180 = vector.load %arg1[%c0_79, %c0_80] : memref<16x128xf32, #tpu.memory_space<vmem>>, vector<16x128xf32>
      %c0_81 = arith.constant 0 : index
      %c0_82 = arith.constant 0 : index
      %181 = vector.load %arg19[%c0_81, %c0_82] : memref<16x128xf32, #tpu.memory_space<vmem>>, vector<16x128xf32>
      tpu.vector_store %arg19[%c0_81, %c0_82], %180 {strides = array<i32>} : memref<16x128xf32, #tpu.memory_space<vmem>>, vector<16x128xf32>,
      %cst_83 = arith.constant 0.000000e+00 : f32
      %182 = vector.broadcast %cst_83 : f32 to vector<16x128xf32>
      %c0_84 = arith.constant 0 : index
      %c0_85 = arith.constant 0 : index
      %183 = vector.load %arg18[%c0_84, %c0_85] : memref<16x128xf32, #tpu.memory_space<vmem>>, vector<16x128xf32>
      tpu.vector_store %arg18[%c0_84, %c0_85], %182 {strides = array<i32>} : memref<16x128xf32, #tpu.memory_space<vmem>>, vector<16x128xf32>,
    } else {
    }
    %c0 = arith.constant 0 : index
    %c0_1 = arith.constant 0 : index
    %3 = vector.load %arg18[%c0, %c0_1] : memref<16x128xf32, #tpu.memory_space<vmem>>, vector<16x128xf32>
    %c0_2 = arith.constant 0 : index
    %c0_3 = arith.constant 0 : index
    %4 = vector.load %arg19[%c0_2, %c0_3] : memref<16x128xf32, #tpu.memory_space<vmem>>, vector<16x128xf32>
    %c0_4 = arith.constant 0 : index
    %c0_5 = arith.constant 0 : index
    %c0_6 = arith.constant 0 : index
    %5 = vector.load %arg9[%c0_4, %c0_5, %c0_6] : memref<1x1x128xf32, #tpu.memory_space<vmem>>, vector<1x1x128xf32>
    %6 = vector.shape_cast %5 : vector<1x1x128xf32> to vector<1x128xf32>
    %7 = arith.addf %3, %4 : vector<16x128xf32>
    %8 = arith.mulf %7, %7 : vector<16x128xf32>
    %cst = arith.constant dense<0.000000e+00> : vector<16xf32>
    %9 = vector.multi_reduction <add>, %8, %cst [1] : vector<16x128xf32> to vector<16xf32>
    %10 = vector.shape_cast %9 : vector<16xf32> to vector<16x1xf32>
    %cst_7 = arith.constant 1.280000e+02 : f32
    %11 = vector.broadcast %cst_7 : f32 to vector<16x1xf32>
    %12 = arith.divf %10, %11 : vector<16x1xf32>
    %cst_8 = arith.constant 9.99999997E-7 : f32
    %13 = vector.broadcast %cst_8 : f32 to vector<16x1xf32>
    %14 = arith.addf %12, %13 : vector<16x1xf32>
    %15 = math.rsqrt %14 : vector<16x1xf32>
    %16 = vector.broadcast %15 : vector<16x1xf32> to vector<16x128xf32>
    %17 = arith.mulf %7, %16 : vector<16x128xf32>
    %18 = vector.broadcast %6 : vector<1x128xf32> to vector<16x128xf32>
    %19 = arith.mulf %17, %18 : vector<16x128xf32>
    %20 = arith.truncf %19 : vector<16x128xf32> to vector<16x128xbf16>
    %c0_9 = arith.constant 0 : index
    %c0_10 = arith.constant 0 : index
    %c0_11 = arith.constant 0 : index
    %21 = vector.load %arg10[%c0_9, %c0_10, %c0_11] : memref<1x128x256xbf16, #tpu.memory_space<vmem>>, vector<1x128x256xbf16>
    %22 = vector.shape_cast %21 : vector<1x128x256xbf16> to vector<128x256xbf16>
    %cst_12 = arith.constant dense<0.000000e+00> : vector<16x256xf32>
    %23 = tpu.matmul %20, %22, %cst_12 {dimension_numbers = #tpu.dot_dimension_numbers<[1], [0], [0], [1], [0, 0, 1, 1], [], []>} : vector<16x128xbf16>, vector<128x256xbf16>, vector<16x256xf32> -> vector<16x256xf32>
    %24 = vector.extract_strided_slice %23 {offsets = [0, 0], sizes = [16, 128], strides = [1, 1]} : vector<16x256xf32> to vector<16x128xf32>
    %25 = vector.extract_strided_slice %23 {offsets = [0, 128], sizes = [16, 64], strides = [1, 1]} : vector<16x256xf32> to vector<16x64xf32>
    %26 = vector.extract_strided_slice %23 {offsets = [0, 192], sizes = [16, 64], strides = [1, 1]} : vector<16x256xf32> to vector<16x64xf32>
    %27 = arith.mulf %24, %24 : vector<16x128xf32>
    %c0_13 = arith.constant 0 : index
    %c0_14 = arith.constant 0 : index
    %28 = vector.load %arg4[%c0_13, %c0_14] : memref<128x128xf32, #tpu.memory_space<vmem>>, vector<128x128xf32>
    %cst_15 = arith.constant dense<0.000000e+00> : vector<16x128xf32>
    %29 = tpu.matmul %27, %28, %cst_15 {dimension_numbers = #tpu.dot_dimension_numbers<[1], [0], [0], [1], [0, 0, 1, 1], [], []>} : vector<16x128xf32>, vector<128x128xf32>, vector<16x128xf32> -> vector<16x128xf32>
    %cst_16 = arith.constant 3.125000e-02 : f32
    %30 = vector.broadcast %cst_16 : f32 to vector<16x128xf32>
    %31 = arith.mulf %29, %30 : vector<16x128xf32>
    %cst_17 = arith.constant 9.99999997E-7 : f32
    %32 = vector.broadcast %cst_17 : f32 to vector<16x128xf32>
    %33 = arith.addf %31, %32 : vector<16x128xf32>
    %34 = math.rsqrt %33 : vector<16x128xf32>
    %35 = arith.mulf %24, %34 : vector<16x128xf32>
    %c0_18 = arith.constant 0 : index
    %c0_19 = arith.constant 0 : index
    %c0_20 = arith.constant 0 : index
    %36 = vector.load %arg11[%c0_18, %c0_19, %c0_20] : memref<1x1x128xf32, #tpu.memory_space<vmem>>, vector<1x1x128xf32>
    %37 = vector.shape_cast %36 : vector<1x1x128xf32> to vector<1x128xf32>
    %38 = vector.broadcast %37 : vector<1x128xf32> to vector<16x128xf32>
    %39 = arith.mulf %35, %38 : vector<16x128xf32>
    %40 = arith.mulf %25, %25 : vector<16x64xf32>
    %c0_21 = arith.constant 0 : index
    %c0_22 = arith.constant 0 : index
    %41 = vector.load %arg5[%c0_21, %c0_22] : memref<64x64xf32, #tpu.memory_space<vmem>>, vector<64x64xf32>
    %cst_23 = arith.constant dense<0.000000e+00> : vector<16x64xf32>
    %42 = tpu.matmul %40, %41, %cst_23 {dimension_numbers = #tpu.dot_dimension_numbers<[1], [0], [0], [1], [0, 0, 1, 1], [], []>} : vector<16x64xf32>, vector<64x64xf32>, vector<16x64xf32> -> vector<16x64xf32>
    %cst_24 = arith.constant 3.125000e-02 : f32
    %43 = vector.broadcast %cst_24 : f32 to vector<16x64xf32>
    %44 = arith.mulf %42, %43 : vector<16x64xf32>
    %cst_25 = arith.constant 9.99999997E-7 : f32
    %45 = vector.broadcast %cst_25 : f32 to vector<16x64xf32>
    %46 = arith.addf %44, %45 : vector<16x64xf32>
    %47 = math.rsqrt %46 : vector<16x64xf32>
    %48 = arith.mulf %25, %47 : vector<16x64xf32>
    %c0_26 = arith.constant 0 : index
    %c0_27 = arith.constant 0 : index
    %c0_28 = arith.constant 0 : index
    %49 = vector.load %arg12[%c0_26, %c0_27, %c0_28] : memref<1x1x64xf32, #tpu.memory_space<vmem>>, vector<1x1x64xf32>
    %50 = vector.shape_cast %49 : vector<1x1x64xf32> to vector<1x64xf32>
    %51 = vector.broadcast %50 : vector<1x64xf32> to vector<16x64xf32>
    %52 = arith.mulf %48, %51 : vector<16x64xf32>
    %c0_29 = arith.constant 0 : index
    %c0_30 = arith.constant 0 : index
    %53 = vector.load %arg2[%c0_29, %c0_30] : memref<16x128xf32, #tpu.memory_space<vmem>>, vector<16x128xf32>
    %c0_31 = arith.constant 0 : index
    %c0_32 = arith.constant 0 : index
    %54 = vector.load %arg3[%c0_31, %c0_32] : memref<16x128xf32, #tpu.memory_space<vmem>>, vector<16x128xf32>
    %55 = arith.mulf %39, %53 : vector<16x128xf32>
    %c0_33 = arith.constant 0 : index
    %c0_34 = arith.constant 0 : index
    %56 = vector.load %arg6[%c0_33, %c0_34] : memref<128x128xf32, #tpu.memory_space<vmem>>, vector<128x128xf32>
    %cst_35 = arith.constant dense<0.000000e+00> : vector<16x128xf32>
    %57 = tpu.matmul %39, %56, %cst_35 {dimension_numbers = #tpu.dot_dimension_numbers<[1], [0], [0], [1], [0, 0, 1, 1], [], []>} : vector<16x128xf32>, vector<128x128xf32>, vector<16x128xf32> -> vector<16x128xf32>
    %58 = arith.mulf %57, %54 : vector<16x128xf32>
    %59 = arith.addf %55, %58 : vector<16x128xf32>
    %60 = vector.extract_strided_slice %53 {offsets = [0, 0], sizes = [16, 64], strides = [1, 1]} : vector<16x128xf32> to vector<16x64xf32>
    %61 = arith.mulf %52, %60 : vector<16x64xf32>
    %c0_36 = arith.constant 0 : index
    %c0_37 = arith.constant 0 : index
    %62 = vector.load %arg7[%c0_36, %c0_37] : memref<64x64xf32, #tpu.memory_space<vmem>>, vector<64x64xf32>
    %cst_38 = arith.constant dense<0.000000e+00> : vector<16x64xf32>
    %63 = tpu.matmul %52, %62, %cst_38 {dimension_numbers = #tpu.dot_dimension_numbers<[1], [0], [0], [1], [0, 0, 1, 1], [], []>} : vector<16x64xf32>, vector<64x64xf32>, vector<16x64xf32> -> vector<16x64xf32>
    %64 = vector.extract_strided_slice %54 {offsets = [0, 0], sizes = [16, 64], strides = [1, 1]} : vector<16x128xf32> to vector<16x64xf32>
    %65 = arith.mulf %63, %64 : vector<16x64xf32>
    %66 = arith.addf %61, %65 : vector<16x64xf32>
    %cst_39 = arith.constant 0.176776692 : f32
    %67 = vector.broadcast %cst_39 : f32 to vector<16x128xf32>
    %68 = arith.mulf %59, %67 : vector<16x128xf32>
    %69 = tpu.iota {dimensions = array<i32: 0>} : vector<32x16xi32>
    %c16_i32 = arith.constant 16 : i32
    %c0_i32_40 = arith.constant 0 : i32
    %70 = arith.cmpi eq, %c16_i32, %c0_i32_40 : i32
    %c1_i32 = arith.constant 1 : i32
    %71 = arith.select %70, %c1_i32, %c16_i32 : i32
    %72 = vector.broadcast %71 : i32 to vector<32x16xi32>
    %73 = arith.remsi %69, %72 : vector<32x16xi32>
    %c0_i32_41 = arith.constant 0 : i32
    %74 = vector.broadcast %c0_i32_41 : i32 to vector<32x16xi32>
    %75 = arith.cmpi ne, %73, %74 : vector<32x16xi32>
    %c0_i32_42 = arith.constant 0 : i32
    %76 = vector.broadcast %c0_i32_42 : i32 to vector<32x16xi32>
    %77 = arith.cmpi slt, %73, %76 : vector<32x16xi32>
    %c0_i32_43 = arith.constant 0 : i32
    %78 = arith.cmpi slt, %71, %c0_i32_43 : i32
    %79 = vector.broadcast %78 : i1 to vector<32x16xi1>
    %80 = vector.broadcast %79 : vector<32x16xi1> to vector<32x16xi1>
    %81 = arith.xori %77, %80 : vector<32x16xi1>
    %82 = arith.andi %81, %75 : vector<32x16xi1>
    %83 = vector.broadcast %71 : i32 to vector<32x16xi32>
    %84 = arith.addi %73, %83 : vector<32x16xi32>
    %85 = arith.select %82, %84, %73 : vector<32x16xi1>, vector<32x16xi32>
    %86 = tpu.iota {dimensions = array<i32: 1>} : vector<32x16xi32>
    %87 = arith.cmpi sle, %86, %85 : vector<32x16xi32>
    %88 = vector.extract_strided_slice %66 {offsets = [0, 0], sizes = [16, 32], strides = [1, 1]} : vector<16x64xf32> to vector<16x32xf32>
    %89 = arith.truncf %88 : vector<16x32xf32> to vector<16x32xbf16>
    %90 = vector.extract_strided_slice %26 {offsets = [0, 0], sizes = [16, 32], strides = [1, 1]} : vector<16x64xf32> to vector<16x32xf32>
    %91 = arith.truncf %90 : vector<16x32xf32> to vector<16x32xbf16>
    %92 = vector.extract_strided_slice %68 {offsets = [0, 0], sizes = [16, 32], strides = [1, 1]} : vector<16x128xf32> to vector<16x32xf32>
    %93 = vector.extract_strided_slice %68 {offsets = [0, 32], sizes = [16, 32], strides = [1, 1]} : vector<16x128xf32> to vector<16x32xf32>
    %94 = tpu.concatenate %92, %93 in 0 : vector<16x32xf32>, vector<16x32xf32> -> vector<32x32xf32>
    %95 = arith.truncf %94 : vector<32x32xf32> to vector<32x32xbf16>
    %cst_44 = arith.constant dense<0.000000e+00> : vector<32x16xf32>
    %96 = tpu.matmul %95, %89, %cst_44 {dimension_numbers = #tpu.dot_dimension_numbers<[1], [1], [0], [0], [0, 0, 1, 0], [], []>} : vector<32x32xbf16>, vector<16x32xbf16>, vector<32x16xf32> -> vector<32x16xf32>
    %cst_45 = arith.constant -1.000000e+30 : f32
    %97 = vector.broadcast %cst_45 : f32 to vector<32x16xf32>
    %98 = arith.select %87, %96, %97 : vector<32x16xi1>, vector<32x16xf32>
    %cst_46 = arith.constant dense<0xFF800000> : vector<32xf32>
    %99 = vector.multi_reduction <maximumf>, %98, %cst_46 [1] : vector<32x16xf32> to vector<32xf32>
    %100 = vector.shape_cast %99 : vector<32xf32> to vector<32x1xf32>
    %101 = vector.broadcast %100 : vector<32x1xf32> to vector<32x16xf32>
    %102 = arith.subf %98, %101 : vector<32x16xf32>
    %103 = math.exp %102 : vector<32x16xf32>
    %cst_47 = arith.constant dense<0.000000e+00> : vector<32xf32>
    %104 = vector.multi_reduction <add>, %103, %cst_47 [1] : vector<32x16xf32> to vector<32xf32>
    %105 = vector.shape_cast %104 : vector<32xf32> to vector<32x1xf32>
    %106 = tpu.reciprocal %105 {approx = true} : vector<32x1xf32> -> vector<32x1xf32>
    %107 = vector.broadcast %106 : vector<32x1xf32> to vector<32x16xf32>
    %108 = arith.mulf %103, %107 : vector<32x16xf32>
    %109 = arith.truncf %108 : vector<32x16xf32> to vector<32x16xbf16>
    %cst_48 = arith.constant dense<0.000000e+00> : vector<32x32xf32>
    %110 = tpu.matmul %109, %91, %cst_48 {dimension_numbers = #tpu.dot_dimension_numbers<[1], [0], [0], [1], [0, 0, 1, 1], [], []>} : vector<32x16xbf16>, vector<16x32xbf16>, vector<32x32xf32> -> vector<32x32xf32>
    %111 = vector.extract_strided_slice %110 {offsets = [0, 0], sizes = [16, 32], strides = [1, 1]} : vector<32x32xf32> to vector<16x32xf32>
    %112 = vector.extract_strided_slice %110 {offsets = [16, 0], sizes = [16, 32], strides = [1, 1]} : vector<32x32xf32> to vector<16x32xf32>
    %113 = vector.extract_strided_slice %66 {offsets = [0, 32], sizes = [16, 32], strides = [1, 1]} : vector<16x64xf32> to vector<16x32xf32>
    %114 = arith.truncf %113 : vector<16x32xf32> to vector<16x32xbf16>
    %115 = vector.extract_strided_slice %26 {offsets = [0, 32], sizes = [16, 32], strides = [1, 1]} : vector<16x64xf32> to vector<16x32xf32>
    %116 = arith.truncf %115 : vector<16x32xf32> to vector<16x32xbf16>
    %117 = vector.extract_strided_slice %68 {offsets = [0, 64], sizes = [16, 32], strides = [1, 1]} : vector<16x128xf32> to vector<16x32xf32>
    %118 = vector.extract_strided_slice %68 {offsets = [0, 96], sizes = [16, 32], strides = [1, 1]} : vector<16x128xf32> to vector<16x32xf32>
    %119 = tpu.concatenate %117, %118 in 0 : vector<16x32xf32>, vector<16x32xf32> -> vector<32x32xf32>
    %120 = arith.truncf %119 : vector<32x32xf32> to vector<32x32xbf16>
    %cst_49 = arith.constant dense<0.000000e+00> : vector<32x16xf32>
    %121 = tpu.matmul %120, %114, %cst_49 {dimension_numbers = #tpu.dot_dimension_numbers<[1], [1], [0], [0], [0, 0, 1, 0], [], []>} : vector<32x32xbf16>, vector<16x32xbf16>, vector<32x16xf32> -> vector<32x16xf32>
    %cst_50 = arith.constant -1.000000e+30 : f32
    %122 = vector.broadcast %cst_50 : f32 to vector<32x16xf32>
    %123 = arith.select %87, %121, %122 : vector<32x16xi1>, vector<32x16xf32>
    %cst_51 = arith.constant dense<0xFF800000> : vector<32xf32>
    %124 = vector.multi_reduction <maximumf>, %123, %cst_51 [1] : vector<32x16xf32> to vector<32xf32>
    %125 = vector.shape_cast %124 : vector<32xf32> to vector<32x1xf32>
    %126 = vector.broadcast %125 : vector<32x1xf32> to vector<32x16xf32>
    %127 = arith.subf %123, %126 : vector<32x16xf32>
    %128 = math.exp %127 : vector<32x16xf32>
    %cst_52 = arith.constant dense<0.000000e+00> : vector<32xf32>
    %129 = vector.multi_reduction <add>, %128, %cst_52 [1] : vector<32x16xf32> to vector<32xf32>
    %130 = vector.shape_cast %129 : vector<32xf32> to vector<32x1xf32>
    %131 = tpu.reciprocal %130 {approx = true} : vector<32x1xf32> -> vector<32x1xf32>
    %132 = vector.broadcast %131 : vector<32x1xf32> to vector<32x16xf32>
    %133 = arith.mulf %128, %132 : vector<32x16xf32>
    %134 = arith.truncf %133 : vector<32x16xf32> to vector<32x16xbf16>
    %cst_53 = arith.constant dense<0.000000e+00> : vector<32x32xf32>
    %135 = tpu.matmul %134, %116, %cst_53 {dimension_numbers = #tpu.dot_dimension_numbers<[1], [0], [0], [1], [0, 0, 1, 1], [], []>} : vector<32x16xbf16>, vector<16x32xbf16>, vector<32x32xf32> -> vector<32x32xf32>
    %136 = vector.extract_strided_slice %135 {offsets = [0, 0], sizes = [16, 32], strides = [1, 1]} : vector<32x32xf32> to vector<16x32xf32>
    %137 = vector.extract_strided_slice %135 {offsets = [16, 0], sizes = [16, 32], strides = [1, 1]} : vector<32x32xf32> to vector<16x32xf32>
    %138 = tpu.concatenate %111, %112, %136, %137 in 1 : vector<16x32xf32>, vector<16x32xf32>, vector<16x32xf32>, vector<16x32xf32> -> vector<16x128xf32>
    %139 = arith.truncf %138 : vector<16x128xf32> to vector<16x128xbf16>
    %c0_54 = arith.constant 0 : index
    %c0_55 = arith.constant 0 : index
    %c0_56 = arith.constant 0 : index
    %140 = vector.load %arg13[%c0_54, %c0_55, %c0_56] : memref<1x128x128xbf16, #tpu.memory_space<vmem>>, vector<1x128x128xbf16>
    %141 = vector.shape_cast %140 : vector<1x128x128xbf16> to vector<128x128xbf16>
    %cst_57 = arith.constant dense<0.000000e+00> : vector<16x128xf32>
    %142 = tpu.matmul %139, %141, %cst_57 {dimension_numbers = #tpu.dot_dimension_numbers<[1], [0], [0], [1], [0, 0, 1, 1], [], []>} : vector<16x128xbf16>, vector<128x128xbf16>, vector<16x128xf32> -> vector<16x128xf32>
    %c0_58 = arith.constant 0 : index
    %c0_59 = arith.constant 0 : index
    %c0_60 = arith.constant 0 : index
    %143 = vector.load %arg14[%c0_58, %c0_59, %c0_60] : memref<1x1x128xf32, #tpu.memory_space<vmem>>, vector<1x1x128xf32>
    %144 = vector.shape_cast %143 : vector<1x1x128xf32> to vector<1x128xf32>
    %145 = arith.addf %142, %7 : vector<16x128xf32>
    %146 = arith.mulf %145, %145 : vector<16x128xf32>
    %cst_61 = arith.constant dense<0.000000e+00> : vector<16xf32>
    %147 = vector.multi_reduction <add>, %146, %cst_61 [1] : vector<16x128xf32> to vector<16xf32>
    %148 = vector.shape_cast %147 : vector<16xf32> to vector<16x1xf32>
    %cst_62 = arith.constant 1.280000e+02 : f32
    %149 = vector.broadcast %cst_62 : f32 to vector<16x1xf32>
    %150 = arith.divf %148, %149 : vector<16x1xf32>
    %cst_63 = arith.constant 9.99999997E-7 : f32
    %151 = vector.broadcast %cst_63 : f32 to vector<16x1xf32>
    %152 = arith.addf %150, %151 : vector<16x1xf32>
    %153 = math.rsqrt %152 : vector<16x1xf32>
    %154 = vector.broadcast %153 : vector<16x1xf32> to vector<16x128xf32>
    %155 = arith.mulf %145, %154 : vector<16x128xf32>
    %156 = vector.broadcast %144 : vector<1x128xf32> to vector<16x128xf32>
    %157 = arith.mulf %155, %156 : vector<16x128xf32>
    %158 = arith.truncf %157 : vector<16x128xf32> to vector<16x128xbf16>
    %c0_64 = arith.constant 0 : index
    %c0_65 = arith.constant 0 : index
    %c0_66 = arith.constant 0 : index
    %159 = vector.load %arg15[%c0_64, %c0_65, %c0_66] : memref<1x128x512xbf16, #tpu.memory_space<vmem>>, vector<1x128x512xbf16>
    %160 = vector.shape_cast %159 : vector<1x128x512xbf16> to vector<128x512xbf16>
    %cst_67 = arith.constant dense<0.000000e+00> : vector<16x512xf32>
    %161 = tpu.matmul %158, %160, %cst_67 {dimension_numbers = #tpu.dot_dimension_numbers<[1], [0], [0], [1], [0, 0, 1, 1], [], []>} : vector<16x128xbf16>, vector<128x512xbf16>, vector<16x512xf32> -> vector<16x512xf32>
    %162 = vector.extract_strided_slice %161 {offsets = [0, 0], sizes = [16, 256], strides = [1, 1]} : vector<16x512xf32> to vector<16x256xf32>
    %163 = vector.extract_strided_slice %161 {offsets = [0, 256], sizes = [16, 256], strides = [1, 1]} : vector<16x512xf32> to vector<16x256xf32>
    %164 = arith.negf %162 : vector<16x256xf32>
    %165 = math.exp %164 : vector<16x256xf32>
    %cst_68 = arith.constant 1.000000e+00 : f32
    %166 = vector.broadcast %cst_68 : f32 to vector<16x256xf32>
    %167 = arith.addf %166, %165 : vector<16x256xf32>
    %168 = arith.divf %166, %167 : vector<16x256xf32>
    %169 = arith.mulf %162, %168 : vector<16x256xf32>
    %170 = arith.mulf %169, %163 : vector<16x256xf32>
    %171 = arith.truncf %170 : vector<16x256xf32> to vector<16x256xbf16>
    %c0_69 = arith.constant 0 : index
    %c0_70 = arith.constant 0 : index
    %c0_71 = arith.constant 0 : index
    %172 = vector.load %arg16[%c0_69, %c0_70, %c0_71] : memref<1x256x128xbf16, #tpu.memory_space<vmem>>, vector<1x256x128xbf16>
    %173 = vector.shape_cast %172 : vector<1x256x128xbf16> to vector<256x128xbf16>
    %cst_72 = arith.constant dense<0.000000e+00> : vector<16x128xf32>
    %174 = tpu.matmul %171, %173, %cst_72 {dimension_numbers = #tpu.dot_dimension_numbers<[1], [0], [0], [1], [0, 0, 1, 1], [], []>} : vector<16x256xbf16>, vector<256x128xbf16>, vector<16x128xf32> -> vector<16x128xf32>
    %c0_73 = arith.constant 0 : index
    %c0_74 = arith.constant 0 : index
    %175 = vector.load %arg18[%c0_73, %c0_74] : memref<16x128xf32, #tpu.memory_space<vmem>>, vector<16x128xf32>
    tpu.vector_store %arg18[%c0_73, %c0_74], %174 {strides = array<i32>} : memref<16x128xf32, #tpu.memory_space<vmem>>, vector<16x128xf32>,
    %c0_75 = arith.constant 0 : index
    %c0_76 = arith.constant 0 : index
    %176 = vector.load %arg19[%c0_75, %c0_76] : memref<16x128xf32, #tpu.memory_space<vmem>>, vector<16x128xf32>
    tpu.vector_store %arg19[%c0_75, %c0_76], %145 {strides = array<i32>} : memref<16x128xf32, #tpu.memory_space<vmem>>, vector<16x128xf32>,
    %c1_i32_77 = arith.constant 1 : i32
    %177 = arith.cmpi eq, %arg0, %c1_i32_77 : i32
    %178 = arith.extui %177 : i1 to i32
    %c0_i32_78 = arith.constant 0 : i32
    %179 = arith.cmpi ne, %178, %c0_i32_78 : i32
    scf.if %179 {
      %c0_79 = arith.constant 0 : index
      %c0_80 = arith.constant 0 : index
      %180 = vector.load %arg8[%c0_79, %c0_80] : memref<1x128xf32, #tpu.memory_space<vmem>>, vector<1x128xf32>
      %181 = arith.addf %174, %145 : vector<16x128xf32>
      %182 = arith.mulf %181, %181 : vector<16x128xf32>
      %cst_81 = arith.constant dense<0.000000e+00> : vector<16xf32>
      %183 = vector.multi_reduction <add>, %182, %cst_81 [1] : vector<16x128xf32> to vector<16xf32>
      %184 = vector.shape_cast %183 : vector<16xf32> to vector<16x1xf32>
      %cst_82 = arith.constant 1.280000e+02 : f32
      %185 = vector.broadcast %cst_82 : f32 to vector<16x1xf32>
      %186 = arith.divf %184, %185 : vector<16x1xf32>
      %cst_83 = arith.constant 9.99999997E-7 : f32
      %187 = vector.broadcast %cst_83 : f32 to vector<16x1xf32>
      %188 = arith.addf %186, %187 : vector<16x1xf32>
      %189 = math.rsqrt %188 : vector<16x1xf32>
      %190 = vector.broadcast %189 : vector<16x1xf32> to vector<16x128xf32>
      %191 = arith.mulf %181, %190 : vector<16x128xf32>
      %192 = vector.broadcast %180 : vector<1x128xf32> to vector<16x128xf32>
      %193 = arith.mulf %191, %192 : vector<16x128xf32>
      %c0_84 = arith.constant 0 : index
      %c0_85 = arith.constant 0 : index
      %194 = vector.load %arg17[%c0_84, %c0_85] : memref<16x128xf32, #tpu.memory_space<vmem>>, vector<16x128xf32>
      tpu.vector_store %arg17[%c0_84, %c0_85], %193 {strides = array<i32>} : memref<16x128xf32, #tpu.memory_space<vmem>>, vector<16x128xf32>,
    } else {
    }
    return
  }
  func.func @transform_0(%arg0: i32) -> (i32, i32) {
    %c0_i32 = arith.constant 0 : i32
    %c0_i32_0 = arith.constant 0 : i32
    %c0_i32_1 = arith.constant 0 : i32
    return %c0_i32, %c0_i32_0 : i32, i32
  }
  func.func @transform_1(%arg0: i32) -> (i32, i32) {
    %c0_i32 = arith.constant 0 : i32
    %c0_i32_0 = arith.constant 0 : i32
    %c0_i32_1 = arith.constant 0 : i32
    return %c0_i32, %c0_i32_0 : i32, i32
  }
  func.func @transform_2(%arg0: i32) -> (i32, i32) {
    %c0_i32 = arith.constant 0 : i32
    %c0_i32_0 = arith.constant 0 : i32
    %c0_i32_1 = arith.constant 0 : i32
    return %c0_i32, %c0_i32_0 : i32, i32
  }
  func.func @transform_3(%arg0: i32) -> (i32, i32) {
    %c0_i32 = arith.constant 0 : i32
    %c0_i32_0 = arith.constant 0 : i32
    %c0_i32_1 = arith.constant 0 : i32
    return %c0_i32, %c0_i32_0 : i32, i32
  }
  func.func @transform_4(%arg0: i32) -> (i32, i32) {
    %c0_i32 = arith.constant 0 : i32
    %c0_i32_0 = arith.constant 0 : i32
    %c0_i32_1 = arith.constant 0 : i32
    return %c0_i32, %c0_i32_0 : i32, i32
  }
  func.func @transform_5(%arg0: i32) -> (i32, i32) {
    %c0_i32 = arith.constant 0 : i32
    %c0_i32_0 = arith.constant 0 : i32
    %c0_i32_1 = arith.constant 0 : i32
    return %c0_i32, %c0_i32_0 : i32, i32
  }
  func.func @transform_6(%arg0: i32) -> (i32, i32) {
    %c0_i32 = arith.constant 0 : i32
    %c0_i32_0 = arith.constant 0 : i32
    %c0_i32_1 = arith.constant 0 : i32
    return %c0_i32, %c0_i32_0 : i32, i32
  }
  func.func @transform_7(%arg0: i32) -> (i32, i32) {
    %c0_i32 = arith.constant 0 : i32
    %c0_i32_0 = arith.constant 0 : i32
    %c0_i32_1 = arith.constant 0 : i32
    return %c0_i32, %c0_i32_0 : i32, i32
  }
  func.func @transform_8(%arg0: i32) -> (i32, i32, i32) {
    %c0_i32 = arith.constant 0 : i32
    %c0_i32_0 = arith.constant 0 : i32
    %c0_i32_1 = arith.constant 0 : i32
    return %arg0, %c0_i32, %c0_i32_0 : i32, i32, i32
  }
  func.func @transform_9(%arg0: i32) -> (i32, i32, i32) {
    %c0_i32 = arith.constant 0 : i32
    %c0_i32_0 = arith.constant 0 : i32
    %c0_i32_1 = arith.constant 0 : i32
    return %arg0, %c0_i32, %c0_i32_0 : i32, i32, i32
  }
  func.func @transform_10(%arg0: i32) -> (i32, i32, i32) {
    %c0_i32 = arith.constant 0 : i32
    %c0_i32_0 = arith.constant 0 : i32
    %c0_i32_1 = arith.constant 0 : i32
    return %arg0, %c0_i32, %c0_i32_0 : i32, i32, i32
  }
  func.func @transform_11(%arg0: i32) -> (i32, i32, i32) {
    %c0_i32 = arith.constant 0 : i32
    %c0_i32_0 = arith.constant 0 : i32
    %c0_i32_1 = arith.constant 0 : i32
    return %arg0, %c0_i32, %c0_i32_0 : i32, i32, i32
  }
  func.func @transform_12(%arg0: i32) -> (i32, i32, i32) {
    %c0_i32 = arith.constant 0 : i32
    %c0_i32_0 = arith.constant 0 : i32
    %c0_i32_1 = arith.constant 0 : i32
    return %arg0, %c0_i32, %c0_i32_0 : i32, i32, i32
  }
  func.func @transform_13(%arg0: i32) -> (i32, i32, i32) {
    %c0_i32 = arith.constant 0 : i32
    %c0_i32_0 = arith.constant 0 : i32
    %c0_i32_1 = arith.constant 0 : i32
    return %arg0, %c0_i32, %c0_i32_0 : i32, i32, i32
  }
  func.func @transform_14(%arg0: i32) -> (i32, i32, i32) {
    %c0_i32 = arith.constant 0 : i32
    %c0_i32_0 = arith.constant 0 : i32
    %c0_i32_1 = arith.constant 0 : i32
    return %arg0, %c0_i32, %c0_i32_0 : i32, i32, i32
  }
  func.func @transform_15(%arg0: i32) -> (i32, i32, i32) {
    %c0_i32 = arith.constant 0 : i32
    %c0_i32_0 = arith.constant 0 : i32
    %c0_i32_1 = arith.constant 0 : i32
    return %arg0, %c0_i32, %c0_i32_0 : i32, i32, i32
  }
  func.func @transform_16(%arg0: i32) -> (i32, i32) {
    %c0_i32 = arith.constant 0 : i32
    %c0_i32_0 = arith.constant 0 : i32
    %c0_i32_1 = arith.constant 0 : i32
    return %c0_i32, %c0_i32_0 : i32, i32
  }
}

</mosaic_0001>

<bundles_post_ra>
// kernel: tile.14
= control target key start
LH: loop header
LB: loop body
LE: loop exit
PB: predicated region body
PF: predicated region fallthrough
CT: control target
= control target key end

     0   :  { %vm82_vm0 = vcmask 1047556   ;;  %vm84_vm1 = vcmask 261120   ;;  %s195_s9 = smov 96   ;;  %s196_s14 = smov 32   ;;  %vm103_vm2 = vcmask 1048320   ;;  %vm124_vm3 = vcmask 785920   ;;  %s289_s0 = inlined_call_operand.vmem [shape: f32[16,4,32], index: 0, kind: input, shape index: {}]   ;;  %s290_s1 = inlined_call_operand.vmem [shape: f32[16,128], index: 1, kind: output, shape index: {}]  }
   0x1   :  { %v180_v0 = vld [vmem:[%s289_s0 + $0x1c] sm:$0xf]  ;;  %v181_v1 = vld [vmem:[%s289_s0 + $0x18] sm:$0xf]  ;;  %v182_v2 = vld [vmem:[%s289_s0 + $0x14] sm:$0xf] }
   0x2   :  { %48 = vst [vmem:[#allocation0 + $0x38] sm:$0xf] %v180_v0  ;;  %53 = vst [vmem:[#allocation0 + $0x30] sm:$0xf] %v181_v1  ;;  %v183_v3 = vld [vmem:[%s289_s0 + $0x10] sm:$0xf] }
   0x3   :  { %58 = vst [vmem:[#allocation0 + $0x28] sm:$0xf] %v182_v2  ;;  %v184_v4 = vld [vmem:[%s289_s0 + $0xc] sm:$0xf]  ;;  %v185_v5 = vld [vmem:[%s289_s0 + $0x8] sm:$0xf] }
   0x4   :  { %63 = vst [vmem:[#allocation0 + $0x20] sm:$0xf] %v183_v3  ;;  %68 = vst [vmem:[#allocation0 + $0x18] sm:$0xf] %v184_v4  ;;  %v186_v6 = vld [vmem:[%s289_s0 + $0x4] sm:$0xf] }
   0x5   :  { %73 = vst [vmem:[#allocation0 + $0x10] sm:$0xf] %v185_v5  ;;  %v78_v7 = vld [vmem:[%s289_s0] sm:$0xf]  ;;  %77 = vst [vmem:[#allocation0 + $0x8] sm:$0xf] %v186_v6 }
   0x6   :  { %79 = vst [vmem:[#allocation0] sm:$0xf] %v78_v7  ;;  %v172_v8 = vld [vmem:[%s289_s0 + $0x3c] sm:$0xf]  ;;  %v173_v9 = vld [vmem:[%s289_s0 + $0x38] sm:$0xf] }
   0x7   :  { %8 = vst [vmem:[#allocation0 + $0x78] sm:$0xf] %v172_v8  ;;  %13 = vst [vmem:[#allocation0 + $0x70] sm:$0xf] %v173_v9  ;;  %v174_v10 = vld [vmem:[%s289_s0 + $0x34] sm:$0xf] }
   0x8   :  { %v175_v11 = vld [vmem:[%s289_s0 + $0x30] sm:$0xf]  ;;  %v176_v12 = vld [vmem:[%s289_s0 + $0x2c] sm:$0xf]  ;;  %18 = vst [vmem:[#allocation0 + $0x68] sm:$0xf] %v174_v10 }
   0x9   :  { %23 = vst [vmem:[#allocation0 + $0x60] sm:$0xf] %v175_v11  ;;  %28 = vst [vmem:[#allocation0 + $0x58] sm:$0xf] %v176_v12  ;;  %v177_v13 = vld [vmem:[%s289_s0 + $0x28] sm:$0xf] }
   0xa   :  { %v178_v14 = vld [vmem:[%s289_s0 + $0x24] sm:$0xf]  ;;  %v179_v15 = vld [vmem:[%s289_s0 + $0x20] sm:$0xf]  ;;  %33 = vst [vmem:[#allocation0 + $0x50] sm:$0xf] %v177_v13 }
   0xb   :  { %38 = vst [vmem:[#allocation0 + $0x48] sm:$0xf] %v178_v14  ;;  %43 = vst [vmem:[#allocation0 + $0x40] sm:$0xf] %v179_v15  ;;  %s194_s0 = smov 64   ;;  %vm145_vm4 = vcmask 523520  }
   0xc   :  { %v119_v16 = vld [vmem:[#allocation0 + $0x2] ss:$8 sm:$0xf0]   ;;  %v98_v17 = vld [vmem:[#allocation0 + $0x3] ss:$8 sm:$0xf0]  }
   0xd   :  { %v117_v18 = vld [vmem:[#allocation0 + $0x2] ss:$8 sm:$0xf]   ;;  %v96_v19 = vld [vmem:[#allocation0 + $0x3] ss:$8 sm:$0xf]  }
   0xe   :  { %v121_v20 = vsel %vm82_vm0, %v119_v16, %v117_v18  ;;  %v100_v21 = vsel %vm82_vm0, %v98_v17, %v96_v19  ;;  %v138_v24 = vld [vmem:[#allocation0 + $0x1] ss:$8 sm:$0xf]   ;;  %v80_v32 = vld [vmem:[#allocation0] ss:$8 sm:$0xf]  }
   0xf   :  { %122 = vrot.lane.b32.xlu1 %v121_v20, %s194_s0  ;;  %101 = vrot.lane.b32.xlu0 %v100_v21, %s195_s9  ;;  %v140_v25 = vld [vmem:[#allocation0 + $0x1] ss:$8 sm:$0xf0]   ;;  %v81_v33 = vld [vmem:[#allocation0] ss:$8 sm:$0xf0]  }
  0x10   :  { %v129_v22 = vld [vmem:[#allocation0 + $0x42] ss:$8 sm:$0xf0]   ;;  %v108_v23 = vld [vmem:[#allocation0 + $0x43] ss:$8 sm:$0xf0]   ;;  %v83_v34 = vsel %vm82_vm0, %v81_v33, %v80_v32  ;;  %v142_v38 = vsel %vm82_vm0, %v140_v25, %v138_v24 }
  0x11   :  { %v150_v31 = vld [vmem:[#allocation0 + $0x41] ss:$8 sm:$0xf0]   ;;  %v89_v36 = vld [vmem:[#allocation0 + $0x40] ss:$8 sm:$0xf0]  }
  0x12   :  { %v127_v26 = vld [vmem:[#allocation0 + $0x42] ss:$8 sm:$0xf]   ;;  %v106_v27 = vld [vmem:[#allocation0 + $0x43] ss:$8 sm:$0xf]  }
  0x13   :  { %v131_v28 = vsel %vm82_vm0, %v129_v22, %v127_v26  ;;  %v110_v29 = vsel %vm82_vm0, %v108_v23, %v106_v27  ;;  %v148_v30 = vld [vmem:[#allocation0 + $0x41] ss:$8 sm:$0xf]   ;;  %v87_v35 = vld [vmem:[#allocation0 + $0x40] ss:$8 sm:$0xf]  }
  0x14   :  { %132 = vrot.lane.b32.xlu1 %v131_v28, %s194_s0  ;;  %111 = vrot.lane.b32.xlu0 %v110_v29, %s195_s9  ;;  %v152_v37 = vsel %vm82_vm0, %v150_v31, %v148_v30  ;;  %85 = vst.msk [vmem:[%s290_s1] sm:$0xff] %vm84_vm1, %v83_v34   ;;  %v91_v39 = vsel %vm82_vm0, %v89_v36, %v87_v35 }
  0x15   :  { %187 = vst.msk [vmem:[%s290_s1 + $0x8] sm:$0xff] %vm84_vm1, %v91_v39  }
  0x18   :  { %153 = vrot.lane.b32.xlu1 %v152_v37, %s196_s14  ;;  %143 = vrot.lane.b32.xlu0 %v142_v38, %s196_s14 }
  0x81   :  { %v123_v40 = vpop.permute.xlu1 %122   ;;  %v102_v41 = vpop.permute.xlu0 %101  }
  0x82   :  { %104 = vst.msk [vmem:[%s290_s1] sm:$0xff] %vm103_vm2, %v102_v41  }
  0x83   :  { %125 = vst.msk [vmem:[%s290_s1] sm:$0xff] %vm124_vm3, %v123_v40  }
  0x86   :  { %v133_v42 = vpop.permute.xlu1 %132   ;;  %v112_v43 = vpop.permute.xlu0 %111  }
  0x87   :  { %188 = vst.msk [vmem:[%s290_s1 + $0x8] sm:$0xff] %vm103_vm2, %v112_v43  }
  0x88   :  { %189 = vst.msk [vmem:[%s290_s1 + $0x8] sm:$0xff] %vm124_vm3, %v133_v42  }
  0x8a   :  { %v154_v44 = vpop.permute.xlu1 %153   ;;  %v144_v45 = vpop.permute.xlu0 %143  }
  0x8b   :  { %190 = vst.msk [vmem:[%s290_s1 + $0x8] sm:$0xff] %vm145_vm4, %v154_v44   ;;  %146 = vst.msk [vmem:[%s290_s1] sm:$0xff] %vm145_vm4, %v144_v45  }

// kernel: qwen3_forward.1
= control target key start
LH: loop header
LB: loop body
LE: loop exit
PB: predicated region body
PF: predicated region fallthrough
CT: control target
= control target key end

     0   :  { %s4346_s0 = inlined_call_operand.vmem [shape: f32[16,128], index: 0, kind: input, shape index: {}]   ;;  %s4347_s1 = inlined_call_operand.vmem [shape: f32[16,128], index: 1, kind: input, shape index: {}]   ;;  %s4348_s2 = inlined_call_operand.vmem [shape: f32[16,128], index: 2, kind: input, shape index: {}]   ;;  %s4349_s3 = inlined_call_operand.hbm [shape: f32[128,128], index: 3, kind: input, shape index: {}]   ;;  %s4350_s4 = inlined_call_operand.vmem [shape: f32[64,64], index: 4, kind: input, shape index: {}]   ;;  %s4351_s5 = inlined_call_operand.hbm [shape: f32[128,128], index: 5, kind: input, shape index: {}]   ;;  %s4352_s6 = inlined_call_operand.hbm [shape: f32[64,64], index: 6, kind: input, shape index: {}]   ;;  %s4353_s7 = inlined_call_operand.vmem [shape: f32[1,128], index: 7, kind: input, shape index: {}]   ;;  %s4354_s8 = inlined_call_operand.vmem [shape: f32[2,1,128], index: 8, kind: input, shape index: {}]   ;;  %s4355_s9 = inlined_call_operand.hbm [shape: bf16[2,128,256], index: 9, kind: input, shape index: {}]   ;;  %s4356_s10 = inlined_call_operand.vmem [shape: f32[2,1,128], index: 10, kind: input, shape index: {}]   ;;  %s4357_s11 = inlined_call_operand.vmem [shape: f32[2,1,64], index: 11, kind: input, shape index: {}]   ;;  %s4358_s12 = inlined_call_operand.hbm [shape: bf16[2,128,128], index: 12, kind: input, shape index: {}]   ;;  %s4359_s13 = inlined_call_operand.vmem [shape: f32[2,1,128], index: 13, kind: input, shape index: {}]   ;;  %s4360_s14 = inlined_call_operand.vmem [shape: bf16[2,128,512], index: 14, kind: input, shape index: {}]   ;;  %s4361_s15 = inlined_call_operand.hbm [shape: bf16[2,256,128], index: 15, kind: input, shape index: {}]   ;;  %s4362_s16 = inlined_call_operand.hbm [shape: f32[16,128], index: 16, kind: output, shape index: {}]  }
   0x1   :  { %4388 = sst [smem:[#allocation24_spill]] %s4346_s0 }
   0x2   :  { %4389 = sst [smem:[#allocation25_spill]] %s4347_s1 }
   0x3   :  { %4390 = sst [smem:[#allocation26_spill]] %s4348_s2 }
   0x4   :  { %4391 = sst [smem:[#allocation27_spill]] %s4350_s4 }
   0x5   :  { %4392 = sst [smem:[#allocation28_spill]] %s4351_s5 }
   0x6   :  { %4393 = sst [smem:[#allocation29_spill]] %s4353_s7 }
   0x7   :  { %4394 = sst [smem:[#allocation30_spill]] %s4355_s9 }
   0x8   :  { %4395 = sst [smem:[#allocation31_spill]] %s4357_s11 }
   0x9   :  { %4396 = sst [smem:[#allocation32_spill]] %s4359_s13 }
   0xa   :  { %4397 = sst [smem:[#allocation33_spill]] %s4360_s14 }
   0xb   :  { %4398 = sst [smem:[#allocation34_spill]] %s4362_s16 }
   0xc   :  { %21 = vsyncpa [#allocation5], 0 }
   0xd   :  { %22 = vsyncpa [#allocation8], 0 }
   0xe   :  { %23 = vsyncpa [#allocation11], 0 }
   0xf   :  { %25 = vsyncpa [#allocation11 + $0x1], 0 }
  0x10   :  { %26 = vsyncpa [#allocation14], 0 }
  0x11   :  { %28 = vsyncpa [#allocation14 + $0x1], 0 }
  0x12   :  { %29 = vsyncpa [#allocation6], 0  ;;  %s3713_s21 = smov 0   ;;  %s3715_s22 = smov 0  }
  0x13   :  { %s3717_s23 = smov 0   ;;  %s3719_s24 = smov 0  }
  0x14 LB: > { %4399 = sst [smem:[#allocation21_spill]] %s3602_s23  ;;  %s3732_s25 = sadd.s32 4294967295, %s3606_s24   ;;  %s3606_s24 = sphi %s3719_s24, %s4450_s24   ;;  %s3602_s23 = sphi %s3717_s23, %s4455_s23   ;;  %s3598_s22 = sphi %s3715_s22, %s4454_s22   ;;  %s3594_s21 = sphi %s3713_s21, %s4453_s21  }
  0x15   : > { %s3735_s26 = sadd.s32 1, %s3606_s24   ;;  %s236_s28 = sadd.s32 1, %s3602_s23 }
  0x16   : > { %4400 = sst [smem:[#allocation22_spill]] %s3735_s26  ;;  %s233_s27 = ssub.s32 %s3606_s24, %s3735_s26 }
  0x17   : > { %p234_p0 = scmp.eq.s32.totalorder %s233_s27, 0  ;;  %p243_p1 = scmp.ne.s32.totalorder %s3602_s23, %s3598_s22 }
  0x18   : > { %p244_p2 = scmp.eq.s32.totalorder %s3606_s24, 0  ;;  %p249_p3 = scmp.ne.s32.totalorder %s3598_s22, %s3594_s21 }
  0x19   : > { %s3745_s29 = scalar_select %p234_p0, %s3602_s23, %s236_s28  }
  0x1a   : > { %p3747_p4 = por %p244_p2, %p243_p1  ;;  %p4368_p5 = scmp.eq.s32.totalorder %s3732_s25, 0 }
  0x1b   : > { %4401 = sst [smem:[#allocation23_spill]] %s3745_s29  ;;  %p2597_p6 = scmp.ge.s32.totalorder %s3606_s24, 1 }
  0x1c   : > { %s4402_s30 = scalar_select %p3747_p4, 1, 0 }
  0x1d   : > { %p437_p7 = scmp.lt.s32.totalorder %s3606_s24, 3  ;;  %p3756_p8 = por %p4368_p5, %p249_p3 }
  0x1e   : > { %s3608_s18 = smov [#allocation7]   ;;  %s3776_s27 = sand.u32 1, %s3602_s23  }
  0x1f   : > { %s4403_s0 = scalar_select %p3756_p8, 1, 0 }
  0x20   : > { %p3761_p10 = pnand %p2597_p6, %p437_p7  ;;  %s474_s19 = sshll.u32 %s3608_s18, 4  ;;  %s475_s19 = int_to_ptr.vmem [resolvable:$true] %s474_s19 }
  0x21   : > { %s4406_s5 = sld [smem:[#allocation28_spill]] }
  0x22   : > { %s4404_s17 = scalar_select %p3761_p10, 1, 0 }
  0x23   : > { %p3094_p11 = pneg %p3761_p10 }
  0x25   : > { %p3769_p12 = pnand %p3094_p11, %p4368_p5 }
  0x27   : > { %s4405_s20 = scalar_select %p3769_p12, 1, 0 }
  0x28   : > { %s3356_s26 = scalar_lea.hbm %s4406_s5, 2048  ;;  %p3786_p1 = pneg %p3769_p12 }
  0x29   : > { %p3357_p0 = scmp.ne.s32.totalorder %s4406_s5, %s3356_s26  ;;  %p3363_p6 = scmp.lt.u32.totalorder %s3356_s26, %s4406_s5 }
  0x2a   : > { %s4407_s18 = scalar_select %p3786_p1, 1, 0 }
  0x2b   : > { %p3359_p2 = pnand %p3786_p1, %p3357_p0 }
  0x2d   : > { %p3360_p3 = pneg %p3359_p2 }
  0x2f   : > { %p3365_p7 = pnand %p3363_p6, %p3360_p3 }
  0x31   : > { %3368 = shalt.err (!%p3365_p7)
}
  0x32   : > { %s3369_s29 = scalar_lea.vmem %s475_s19, 2048  ;;  %p3377_p13 = scmp.lt.s32.totalorder %s475_s19, %s475_s19 }
  0x33   : > { %p3370_p11 = scmp.ne.s32.totalorder %s475_s19, %s3369_s29  ;;  %p3378_p8 = scmp.lt.s32.totalorder %s3369_s29, %s3369_s29 }
  0x35   : > { %p3372_p9 = pnand %p3370_p11, %p3786_p1  ;;  %p3379_p10 = por %p3378_p8, %p3377_p13 }
  0x37   : > { %p3373_p5 = pneg %p3372_p9 }
  0x39   : > { %p3380_p4 = pnand %p3379_p10, %p3373_p5 }
  0x3b   : > { %3383 = shalt.err (!%p3380_p4)
}
  0x3c   : > { %s4376_s7 = smov 128   ;;  %s4378_s16 = smov 8  }
  0x3d   : > { %3100 = dma.hbm_to_vmem [thread:$0]  (!%p3769_p12), %s4406_s5, 2048, %s475_s19, [#allocation8], %s4376_s7, %s4376_s7, %s4378_s16  }
  0x3e   : > { %s4375_s21 = sshll.u32 %s3776_s27, 7  ;;  %s4374_s28 = sshll.u32 %s3606_s24, 11 }
  0x3f   : > { %s4408_s9 = sld [smem:[#allocation30_spill]]  ;;  %s514_s4 = scalar_lea.vmem [#allocation10], %s4375_s21 }
  0x40   : > { %s521_s14 = sshll.u32 %s514_s4, 4  ;;  %p4409_p4 = scmp.ne.s32.totalorder %s4402_s30, 0  ;;  %s3824_s14 = int_to_ptr.vmem [resolvable:$true] %s521_s14 }
  0x41   : > { %p4410_p5 = scmp.lt.s32.totalorder %s3606_s24, 2  ;;  %s3611_s19 = smov [#allocation4]  }
  0x42   : > { %s3826_s2 = sshll.u32 %s3611_s19, 4  ;;  %s4412_s26 = sand.u32 1, %s3606_s24   ;;  %s459_s2 = int_to_ptr.vmem [resolvable:$true] %s3826_s2 }
  0x43   : > { %p3820_p8 = pnand %p4410_p5, %p4409_p4  ;;  %s3830_s29 = scalar_lea.sflag [#allocation11], %s4412_s26 }
  0x45   : > { %s3812_s1 = scalar_lea.hbm %s4408_s9, %s4374_s28  ;;  %p3836_p10 = pneg %p3820_p8 }
  0x46   : > { %s4411_s23 = scalar_select %p3820_p8, 1, 0 }
  0x47   : > { %s3384_s28 = scalar_lea.hbm %s3812_s1, 2048  ;;  %s3389_s7 = scalar_lea.hbm %s4408_s9, 4096 }
  0x48   : > { %p3385_p9 = scmp.ne.s32.totalorder %s3812_s1, %s3384_s28  ;;  %p3390_p2 = scmp.lt.u32.totalorder %s3812_s1, %s4408_s9 }
  0x49   : > { %s4413_s4 = scalar_select %p3836_p10, 1, 0 }
  0x4a   : > { %p3387_p13 = pnand %p3836_p10, %p3385_p9  ;;  %p3391_p3 = scmp.lt.u32.totalorder %s3389_s7, %s3384_s28 }
  0x4b   : > { %p3393_p7 = scmp.lt.u32.totalorder %s3384_s28, %s3812_s1 }
  0x4c   : > { %p3388_p0 = pneg %p3387_p13  ;;  %p3392_p6 = por %p3391_p3, %p3390_p2 }
  0x4e   : > { %p3394_p11 = por %p3393_p7, %p3392_p6 }
  0x50   : > { %p3395_p4 = pnand %p3394_p11, %p3388_p0 }
  0x52   : > { %3398 = shalt.err (!%p3395_p4)
}
  0x53   : > { %s3399_s26 = scalar_lea.vmem %s3824_s14, 2048  ;;  %s3612_s21 = smov [#allocation10]  }
  0x54   : > { %p3400_p5 = scmp.ne.s32.totalorder %s3824_s14, %s3399_s26  ;;  %s3404_s30 = sshll.u32 %s3612_s21, 4  ;;  %s3405_s30 = int_to_ptr.vmem [resolvable:$false] %s3404_s30 }
  0x55   : > { %s3406_s16 = scalar_lea.vmem %s3405_s30, 4096  ;;  %p3407_p12 = scmp.lt.s32.totalorder %s3824_s14, %s3405_s30 }
  0x56   : > { %p3402_p9 = pnand %p3400_p5, %p3836_p10  ;;  %p3408_p1 = scmp.lt.s32.totalorder %s3406_s16, %s3399_s26 }
  0x58   : > { %p3403_p13 = pneg %p3402_p9  ;;  %p3409_p2 = por %p3408_p1, %p3407_p12 }
  0x5a   : > { %p3410_p3 = pnand %p3409_p2, %p3403_p13 }
  0x5c   : > { %3413 = shalt.err (!%p3410_p3)
}
  0x5d   : > { %s4414_s7 = smov 8   ;;  %s4415_s28 = smov 128  }
  0x5e   : > { %3107 = dma.hbm_to_vmem [thread:$0]  (!%p3820_p8), %s3812_s1, 2048, %s3824_s14, %s3830_s29, %s4415_s28, %s4415_s28, %s4414_s7  }
  0x5f   : > { %s3414_s30 = scalar_lea.hbm %s4349_s3, 2048  ;;  %p4416_p1 = scmp.ne.s32.totalorder %s4407_s18, 0 }
  0x60   : > { %p3415_p12 = scmp.ne.s32.totalorder %s4349_s3, %s3414_s30  ;;  %p3421_p7 = scmp.lt.u32.totalorder %s3414_s30, %s4349_s3 }
  0x62   : > { %p3417_p0 = pnand %p3415_p12, %p4416_p1 }
  0x64   : > { %p3418_p6 = pneg %p3417_p0 }
  0x66   : > { %p3423_p11 = pnand %p3421_p7, %p3418_p6 }
  0x68   : > { %3426 = shalt.err (!%p3423_p11)
}
  0x69   : > { %s3427_s13 = scalar_lea.vmem %s459_s2, 2048  ;;  %p3435_p13 = scmp.lt.s32.totalorder %s459_s2, %s459_s2 }
  0x6a   : > { %p3428_p4 = scmp.ne.s32.totalorder %s459_s2, %s3427_s13  ;;  %p3436_p2 = scmp.lt.s32.totalorder %s3427_s13, %s3427_s13 }
  0x6c   : > { %p3430_p5 = pnand %p3428_p4, %p4416_p1  ;;  %p3437_p3 = por %p3436_p2, %p3435_p13 }
  0x6e   : > { %p3431_p9 = pneg %p3430_p5 }
  0x70   : > { %p3438_p8 = pnand %p3437_p3, %p3431_p9 }
  0x72   : > { %3441 = shalt.err (!%p3438_p8)
}
  0x73   : > { %p4417_p12 = scmp.ne.s32.totalorder %s4405_s20, 0  ;;  %s3613_s9 = smov [#allocation9]  }
  0x74   : > { %s487_s14 = sshll.u32 %s3613_s9, 4  ;;  %s2605_s19 = sshll.u32 %s3776_s27, 6  ;;  %s488_s14 = int_to_ptr.vmem [resolvable:$true] %s487_s14 }
  0x75   : > { %3097 = dma.hbm_to_vmem [thread:$0]  (!%p4417_p12), %s4349_s3, 2048, %s459_s2, [#allocation5], %s4415_s28, %s4415_s28, %s4414_s7  }
  0x76   : > { %s3442_s30 = scalar_lea.hbm %s4352_s6, 1024 }
  0x77   : > { %p3443_p8 = scmp.ne.s32.totalorder %s4352_s6, %s3442_s30  ;;  %p3449_p7 = scmp.lt.u32.totalorder %s3442_s30, %s4352_s6 }
  0x79   : > { %p3445_p0 = pnand %p3443_p8, %p4416_p1 }
  0x7b   : > { %p3446_p6 = pneg %p3445_p0 }
  0x7d   : > { %p3451_p11 = pnand %p3449_p7, %p3446_p6 }
  0x7f   : > { %3454 = shalt.err (!%p3451_p11)
}
  0x80   : > { %s3455_s2 = scalar_lea.vmem %s488_s14, 1024  ;;  %p3463_p13 = scmp.lt.s32.totalorder %s488_s14, %s488_s14 }
  0x81   : > { %p3456_p4 = scmp.ne.s32.totalorder %s488_s14, %s3455_s2  ;;  %p3464_p2 = scmp.lt.s32.totalorder %s3455_s2, %s3455_s2 }
  0x83   : > { %p3458_p5 = pnand %p3456_p4, %p4416_p1  ;;  %p3465_p3 = por %p3464_p2, %p3463_p13 }
  0x85   : > { %p3459_p9 = pneg %p3458_p5 }
  0x87   : > { %p3466_p10 = pnand %p3465_p3, %p3459_p9 }
  0x89   : > { %3469 = shalt.err (!%p3466_p10)
}
  0x8a   : > { %3103 = dma.hbm_to_vmem [thread:$0]  (!%p4417_p12), %s4352_s6, 1024, %s488_s14, [#allocation8], %s4415_s28, %s4415_s28, %s4414_s7  }
  0x8b   : > { %s2720_s9 = sshll.u32 %s3606_s24, 10  ;;  %s547_s18 = scalar_lea.vmem [#allocation12], %s2605_s19 }
  0x8c   : > { %s554_s21 = sshll.u32 %s547_s18, 4  ;;  %s3911_s26 = scalar_lea.hbm %s4358_s12, %s2720_s9  ;;  %s3913_s21 = int_to_ptr.vmem [resolvable:$true] %s554_s21 }
  0x8d   : > { %s3470_s20 = scalar_lea.hbm %s3911_s26, 1024  ;;  %p4418_p1 = scmp.ne.s32.totalorder %s4413_s4, 0 }
  0x8e   : > { %p3471_p10 = scmp.ne.s32.totalorder %s3911_s26, %s3470_s20  ;;  %s3475_s14 = scalar_lea.hbm %s4358_s12, 2048 }
  0x8f   : > { %p3476_p12 = scmp.lt.u32.totalorder %s3911_s26, %s4358_s12  ;;  %p3477_p6 = scmp.lt.u32.totalorder %s3475_s14, %s3470_s20 }
  0x90   : > { %p3473_p8 = pnand %p3471_p10, %p4418_p1  ;;  %p3479_p11 = scmp.lt.u32.totalorder %s3470_s20, %s3911_s26 }
  0x91   : > { %p3478_p7 = por %p3477_p6, %p3476_p12 }
  0x92   : > { %p3474_p0 = pneg %p3473_p8 }
  0x93   : > { %p3480_p4 = por %p3479_p11, %p3478_p7 }
  0x95   : > { %p3481_p5 = pnand %p3480_p4, %p3474_p0 }
  0x97   : > { %3484 = shalt.err (!%p3481_p5)
}
  0x98   : > { %s3485_s1 = scalar_lea.vmem %s3913_s21, 1024  ;;  %s3614_s2 = smov [#allocation12]  }
  0x99   : > { %p3486_p9 = scmp.ne.s32.totalorder %s3913_s21, %s3485_s1  ;;  %s3490_s11 = sshll.u32 %s3614_s2, 4  ;;  %s3491_s11 = int_to_ptr.vmem [resolvable:$false] %s3490_s11 }
  0x9a   : > { %s3492_s5 = scalar_lea.vmem %s3491_s11, 2048  ;;  %p3493_p3 = scmp.lt.s32.totalorder %s3913_s21, %s3491_s11 }
  0x9b   : > { %p3488_p13 = pnand %p3486_p9, %p4418_p1  ;;  %p3494_p10 = scmp.lt.s32.totalorder %s3492_s5, %s3485_s1 }
  0x9d   : > { %p3489_p2 = pneg %p3488_p13  ;;  %p3495_p8 = por %p3494_p10, %p3493_p3 }
  0x9f   : > { %p3496_p12 = pnand %p3495_p8, %p3489_p2 }
  0xa1   : > { %3499 = shalt.err (!%p3496_p12)
}
  0xa2   : > { %s3615_s9 = smov 64   ;;  %s3616_s18 = smov 4  }
  0xa3   : > { %p4419_p0 = scmp.ne.s32.totalorder %s4411_s23, 0  ;;  %s4420_s13 = sshll.u32 %s3606_s24, 11 }
  0xa4   : > { %s3945_s7 = scalar_lea.hbm %s4361_s15, %s4420_s13  ;;  %s4421_s28 = sshll.u32 %s3776_s27, 7 }
  0xa5   : > { %3110 = dma.hbm_to_vmem [thread:$0]  (!%p4419_p0), %s3911_s26, 1024, %s3913_s21, %s3830_s29, %s3615_s9, %s3615_s9, %s3616_s18  }
  0xa6   : > { %s582_s14 = scalar_lea.vmem [#allocation13], %s4421_s28  ;;  %s579_s16 = scalar_lea.sflag [#allocation14], %s3776_s27 }
  0xa7   : > { %s589_s19 = sshll.u32 %s582_s14, 4  ;;  %s3500_s1 = scalar_lea.hbm %s3945_s7, 2048  ;;  %s3949_s19 = int_to_ptr.vmem [resolvable:$true] %s589_s19 }
  0xa8   : > { %p3501_p6 = scmp.ne.s32.totalorder %s3945_s7, %s3500_s1  ;;  %s3505_s21 = scalar_lea.hbm %s4361_s15, 4096 }
  0xa9   : > { %p3506_p4 = scmp.lt.u32.totalorder %s3945_s7, %s4361_s15  ;;  %p3507_p5 = scmp.lt.u32.totalorder %s3505_s21, %s3500_s1 }
  0xaa   : > { %p3503_p7 = pnand %p3501_p6, %p4418_p1  ;;  %p3509_p13 = scmp.lt.u32.totalorder %s3500_s1, %s3945_s7 }
  0xab   : > { %p3508_p9 = por %p3507_p5, %p3506_p4 }
  0xac   : > { %p3504_p11 = pneg %p3503_p7 }
  0xad   : > { %p3510_p2 = por %p3509_p13, %p3508_p9 }
  0xaf   : > { %p3511_p3 = pnand %p3510_p2, %p3504_p11 }
  0xb1   : > { %3514 = shalt.err (!%p3511_p3)
}
  0xb2   : > { %s3515_s11 = scalar_lea.vmem %s3949_s19, 2048  ;;  %s3617_s5 = smov [#allocation13]  }
  0xb3   : > { %p3516_p10 = scmp.ne.s32.totalorder %s3949_s19, %s3515_s11  ;;  %s3520_s13 = sshll.u32 %s3617_s5, 4  ;;  %s3521_s13 = int_to_ptr.vmem [resolvable:$false] %s3520_s13 }
  0xb4   : > { %s3522_s30 = scalar_lea.vmem %s3521_s13, 4096  ;;  %p3523_p6 = scmp.lt.s32.totalorder %s3949_s19, %s3521_s13 }
  0xb5   : > { %p3518_p8 = pnand %p3516_p10, %p4418_p1  ;;  %p3524_p7 = scmp.lt.s32.totalorder %s3522_s30, %s3515_s11 }
  0xb7   : > { %p3519_p12 = pneg %p3518_p8  ;;  %p3525_p4 = por %p3524_p7, %p3523_p6 }
  0xb9   : > { %p3526_p5 = pnand %p3525_p4, %p3519_p12 }
  0xbb   : > { %3529 = shalt.err (!%p3526_p5)
}
  0xbc   : > { %3113 = dma.hbm_to_vmem [thread:$0]  (!%p4419_p0), %s3945_s7, 2048, %s3949_s19, %s579_s16, %s3615_s9, %s3615_s9, %s3616_s18  }
  0xbd   : > { %p4422_p1 = scmp.ne.s32.totalorder %s4404_s17, 0 }
  0xbe   : > { %p4423_p11 = scmp.eq.s32.totalorder (!%p4422_p1), %s3732_s25, 0 }
  0xbf   : > { %601 = sbr.rel (%p4422_p1) target bundleno = 3667 (0xe53), region = 84 }
  0xc6   : > { %3573 = dma.done.wait (%p4423_p11), [#allocation5], 2048   ;;  %p4424_p9 = pmov %p4423_p11 }
  0xc8   : > { %3575 = vsyncadd (%p4424_p9), [#allocation5], 4294965248  ;;  %p4425_p13 = pmov %p4424_p9 }
  0xc9   : > { %p4426_p2 = pmov %p4424_p9 }
  0xca   : > { %3577 = dma.done.wait (%p4425_p13), [#allocation8], 3072  }
  0xcb   : > { %3579 = vsyncadd (%p4426_p2), [#allocation8], 4294964224  ;;  %s615_s27 = sand.u32 1, %s3732_s25   ;;  %s617_s23 = sand.u32 1, %s3598_s22  }
  0xcc   : > { %s2615_s4 = sshll.u32 %s617_s23, 7  ;;  %s616_s17 = scalar_lea.sflag [#allocation11], %s615_s27 }
  0xcd   : > { %s3990_s9 = scalar_lea.vmem [#allocation10], %s2615_s4  ;;  %p4427_p0 = scmp.ne.s32.totalorder %s4403_s0, 0 }
  0xcf   : > { %3581 = dma.done.wait (%p4427_p0), %s616_s17, 3072  }
  0xd0   : > { %3583 = vsyncadd (%p4427_p0), %s616_s17, 4294964224  ;;  %s2616_s18 = sshll.u32 %s617_s23, 6  ;;  %s634_s7 = scalar_lea.sflag [#allocation14], %s617_s23 }
  0xd1   : > { %s3996_s20 = scalar_lea.vmem [#allocation12], %s2616_s18  ;;  %s3998_s28 = scalar_lea.vmem [#allocation13], %s2615_s4 }
  0xd2   : > { %3585 = dma.done.wait (%p4427_p0), %s634_s7, 2048  }
  0xd3   : > { %3587 = vsyncadd (%p4427_p0), %s634_s7, 4294965248  ;;  %p708_p3 = scmp.lt.s32.totalorder %s3732_s25, 1  ;;  %s4428_s2 = sld [smem:[#allocation31_spill]] }
  0xd4   : > { %s4429_s30 = sld [smem:[#allocation32_spill]]  ;;  %s4430_s18 = sld [smem:[#allocation33_spill]] }
  0xd5   : > { %s4006_s14 = scalar_select %p708_p3, %s3732_s25, 1 }
  0xd6   : > { %p4431_p10 = scmp.ne.s32.totalorder %s3732_s25, 0 }
  0xd7   : > { %s710_s1 = scalar_lea.vmem %s4354_s8, %s4006_s14  ;;  %s2722_s23 = sshll.u32 %s4006_s14, 8  ;;  %v3618_v2 = vmov (!%p4431_p10), 0.0  }
  0xd8   : > { %729 = sbr.rel (%p4431_p10) target bundleno = 225 (0xe1), region = 112  ;;  %s4432_s24 = sld [smem:[#allocation24_spill]] (!%p4431_p10)  ;;  %734 = vst [vmem:[#allocation2] sm:$0xff] (!%p4431_p10), %v3618_v2  ;;  %735 = vst [vmem:[#allocation2 + $0x8] sm:$0xff] (!%p4431_p10), %v3618_v2 }
  0xd9   : > { %s716_s11 = scalar_lea.vmem %s4428_s2, %s4006_s14 }
  0xda   : > { %s719_s27 = scalar_lea.vmem %s4429_s30, %s4006_s14  ;;  %s4028_s7 = scalar_lea.vmem %s4430_s18, %s2722_s23 }
  0xde   : > { %s4433_s29 = smov (!%p4431_p10), %s4432_s24  ;;  %v730_v0 = vld [vmem:[%s4432_s24] sm:$0xff] (!%p4431_p10) }
  0xdf   : > { %v731_v1 = vld [vmem:[%s4433_s29 + $0x8] sm:$0xff]  ;;  %732 = vst [vmem:[#allocation3] sm:$0xff] %v730_v0 }
  0xe0   : > { %733 = vst [vmem:[#allocation3 + $0x8] sm:$0xff] %v731_v1 }
  0xe1 PF: > { %v736_v3 = vld [vmem:[#allocation2] sm:$0xff]  ;;  %v737_v5 = vld [vmem:[#allocation2 + $0x8] sm:$0xff]  ;;  %v3195_v12 = vld [vmem:[%s3990_s9 + $0x14] ss:$8 sps:$4 sm:$0xff]   ;;  %v3619_v24 = vmov 0   ;;  %s4434_s2 = sld [smem:[#allocation27_spill]]  ;;  %s4435_s30 = scalar_lea.vmem %s4356_s10, %s4006_s14 }
  0xe2   : > { %v3192_v9 = vld [vmem:[%s3990_s9 + $0x4] ss:$8 sps:$4 sm:$0xff]   ;;  %v3194_v10 = vld [vmem:[%s3990_s9] ss:$8 sps:$4 sm:$0xff]   ;;  %v3197_v13 = vld [vmem:[%s3990_s9 + $0x10] ss:$8 sps:$4 sm:$0xff]   ;;  %895 = vmatprep.mubr.bf16.mxu0 %v3619_v24 }
  0xe3   : > { %863 = vmatprep.subr.bf16.mxu0 %v3192_v9  ;;  %v3198_v15 = vld [vmem:[%s3990_s9 + $0x24] ss:$8 sps:$4 sm:$0xff]   ;;  %v3200_v16 = vld [vmem:[%s3990_s9 + $0x20] ss:$8 sps:$4 sm:$0xff]   ;;  %v3201_v17 = vld [vmem:[%s3990_s9 + $0x34] ss:$8 sps:$4 sm:$0xff]  }
  0xe4   : > { %864 = vmatpush1.bf16.msra.mxu0 %v3194_v10  ;;  %v3203_v18 = vld [vmem:[%s3990_s9 + $0x30] ss:$8 sps:$4 sm:$0xff]   ;;  %v3204_v19 = vld [vmem:[%s3990_s9 + $0x44] ss:$8 sps:$4 sm:$0xff]   ;;  %v3206_v20 = vld [vmem:[%s3990_s9 + $0x40] ss:$8 sps:$4 sm:$0xff]  }
  0xe5   : > { %865 = vmatprep.subr.bf16.mxu0 %v3195_v12  ;;  %v3207_v21 = vld [vmem:[%s3990_s9 + $0x54] ss:$8 sps:$4 sm:$0xff]   ;;  %v3209_v22 = vld [vmem:[%s3990_s9 + $0x50] ss:$8 sps:$4 sm:$0xff]   ;;  %v3210_v23 = vld [vmem:[%s3990_s9 + $0x64] ss:$8 sps:$4 sm:$0xff]  }
  0xe6   : > { %v3212_v25 = vld [vmem:[%s3990_s9 + $0x60] ss:$8 sps:$4 sm:$0xff]   ;;  %v3213_v26 = vld [vmem:[%s3990_s9 + $0x74] ss:$8 sps:$4 sm:$0xff]   ;;  %v3215_v27 = vld [vmem:[%s3990_s9 + $0x70] ss:$8 sps:$4 sm:$0xff]  }
  0xe7   : > { %v739_v7 = vld [vmem:[#allocation3 + $0x8] sm:$0xff]  ;;  %v908_v28 = vld [vmem:[#allocation4] sm:$0xff]  ;;  %v909_v29 = vld [vmem:[#allocation4 + $0x8] sm:$0xff]  ;;  %vm1026_vm0 = vcmask 523264   ;;  %s4437_s16 = sld [smem:[#allocation25_spill]]  ;;  %s4438_s0 = sld [smem:[#allocation26_spill]] }
  0xe8   : > { %v738_v4 = vld [vmem:[#allocation3] sm:$0xff]  ;;  %v4040_v8 = vadd.f32 %v739_v7, %v737_v5  ;;  %866 = vmatpush1.bf16.msra.mxu0 %v3197_v13  ;;  %v2974_v31 = vpack.c.bf16 %v909_v29, %v908_v28  ;;  %v911_v32 = vld [vmem:[#allocation4 + $0x18] sm:$0xff]  ;;  %v912_v34 = vld [vmem:[#allocation4 + $0x20] sm:$0xff]  ;;  %vm1394_vm1 = vcmask 261120   ;;  %s3620_s13 = smov 96   ;;  %vm1457_vm4 = vcmask 130048  }
  0xe9   : > { %v4038_v6 = vadd.f32 %v738_v4, %v736_v3  ;;  %867 = vmatprep.subr.bf16.mxu0 %v3198_v15  ;;  %v910_v30 = vld [vmem:[#allocation4 + $0x10] sm:$0xff]  ;;  %v913_v35 = vld [vmem:[#allocation4 + $0x28] sm:$0xff]  ;;  %v1018_v36 = vld [vmem:[%s4434_s2] sm:$0xff]  ;;  %s3621_s9 = smov 64   ;;  %vm3624_vm7 = vmmov 0   ;;  %vm1766_vm8 = vcmask 785408  }
  0xea   : > { %v744_v14 = vmul.f32 %v4040_v8, %v4040_v8  ;;  %v2978_v33 = vpack.c.bf16 %v911_v32, %v910_v30  ;;  %2975 = vmatprep.subr.bf16.mxu1 %v2974_v31  ;;  %v1019_v37 = vld [vmem:[%s4434_s2 + $0x8] sm:$0xff]  ;;  %v2982_v39 = vpack.c.bf16 %v913_v35, %v912_v34  ;;  %v914_v40 = vld [vmem:[#allocation4 + $0x30] sm:$0xff]  ;;  %v915_v41 = vld [vmem:[#allocation4 + $0x38] sm:$0xff]  ;;  %p2713_p8 = scmp.ne.s32.totalorder %s3732_s25, 1 }
  0xeb   : > { %v743_v11 = vmul.f32 %v4038_v6, %v4038_v6  ;;  %2977 = vmatpush3.bf16.msra.mxu1 %v2974_v31  ;;  %v3006_v38 = vpack.c.bf16 %v1019_v37, %v1018_v36  ;;  %v2986_v42 = vpack.c.bf16 %v915_v41, %v914_v40  ;;  %v916_v43 = vld [vmem:[#allocation4 + $0x40] sm:$0xff]  ;;  %v917_v44 = vld [vmem:[#allocation4 + $0x48] sm:$0xff]  ;;  %v918_v46 = vld [vmem:[#allocation4 + $0x50] sm:$0xff] }
  0xec   : > { %868 = vmatpush1.bf16.msra.mxu0 %v3200_v16  ;;  %2979 = vmatprep.subr.bf16.mxu1 %v2978_v33  ;;  %v2990_v45 = vpack.c.bf16 %v917_v44, %v916_v43  ;;  %v919_v47 = vld [vmem:[#allocation4 + $0x58] sm:$0xff]  ;;  %v920_v49 = vld [vmem:[#allocation4 + $0x60] sm:$0xff]  ;;  %v921_v50 = vld [vmem:[#allocation4 + $0x68] sm:$0xff] }
  0xed   : > { %745 = vadd.xlane.f32.xlu0 %v743_v11  ;;  %869 = vmatprep.subr.bf16.mxu0 %v3201_v17  ;;  %v2994_v48 = vpack.c.bf16 %v919_v47, %v918_v46  ;;  %v2998_v51 = vpack.c.bf16 %v921_v50, %v920_v49  ;;  %v2621_v61 = vld [vmem:[%s710_s1] ss:$0 sm:$0xff]  ;;  %v1020_v63 = vld [vmem:[%s4434_s2 + $0x10] sm:$0xff]  ;;  %v1021_v0 = vld [vmem:[%s4434_s2 + $0x18] sm:$0xff] }
  0xee   : > { %v3010_v4 = vpack.c.bf16 %v1021_v0, %v1020_v63  ;;  %v1022_v5 = vld [vmem:[%s4434_s2 + $0x20] sm:$0xff]  ;;  %v1023_v7 = vld [vmem:[%s4434_s2 + $0x28] sm:$0xff]  ;;  %v922_v10 = vld [vmem:[#allocation4 + $0x70] sm:$0xff] }
  0xef   : > { %2981 = vmatpush3.bf16.msra.mxu1 %v2978_v33  ;;  %v3014_v9 = vpack.c.bf16 %v1023_v7, %v1022_v5  ;;  %v923_v11 = vld [vmem:[#allocation4 + $0x78] sm:$0xff]  ;;  %v1024_v13 = vld [vmem:[%s4434_s2 + $0x30] sm:$0xff]  ;;  %v1131_v16 = vld [vmem:[#allocation7] sm:$0xff] }
  0xf0   : > { %870 = vmatpush1.bf16.msra.mxu0 %v3203_v18  ;;  %2983 = vmatprep.subr.bf16.mxu1 %v2982_v39  ;;  %v3002_v12 = vpack.c.bf16 %v923_v11, %v922_v10  ;;  %v1132_v17 = vld [vmem:[#allocation7 + $0x8] sm:$0xff]  ;;  %v1135_v32 = vld [vmem:[#allocation7 + $0x20] sm:$0xff]  ;;  %v1137_v35 = vld [vmem:[#allocation7 + $0x30] sm:$0xff] }
  0xf1   : > { %747 = vadd.xlane.f32.xlu0 %v744_v14  ;;  %871 = vmatprep.subr.bf16.mxu0 %v3204_v19  ;;  %v1025_v14 = vld [vmem:[%s4434_s2 + $0x38] sm:$0xff]  ;;  %v3022_v18 = vpack.c.bf16 %v1132_v17, %v1131_v16  ;;  %v1136_v33 = vld [vmem:[#allocation7 + $0x28] sm:$0xff]  ;;  %v1228_v41 = vld [vmem:[#allocation9] sm:$0xff] }
  0xf2   : > { %v3018_v15 = vpack.c.bf16 %v1025_v14, %v1024_v13  ;;  %v3030_v34 = vpack.c.bf16 %v1136_v33, %v1135_v32  ;;  %v1138_v36 = vld [vmem:[#allocation7 + $0x38] sm:$0xff]  ;;  %v1141_v44 = vld [vmem:[#allocation7 + $0x50] sm:$0xff]  ;;  %v1143_v49 = vld [vmem:[#allocation7 + $0x60] sm:$0xff] }
  0xf3   : > { %2985 = vmatpush3.bf16.msra.mxu1 %v2982_v39  ;;  %v3034_v37 = vpack.c.bf16 %v1138_v36, %v1137_v35  ;;  %v1140_v39 = vld [vmem:[#allocation7 + $0x48] sm:$0xff]  ;;  %v1230_v46 = vld [vmem:[#allocation9 + $0x10] sm:$0xff] }
  0xf4   : > { %872 = vmatpush1.bf16.msra.mxu0 %v3206_v20  ;;  %2987 = vmatprep.subr.bf16.mxu1 %v2986_v42  ;;  %v1133_v20 = vld [vmem:[#allocation7 + $0x10] sm:$0xff]  ;;  %v1144_v50 = vld [vmem:[#allocation7 + $0x68] sm:$0xff] }
  0xf5   : > { %873 = vmatprep.subr.bf16.mxu0 %v3207_v21  ;;  %v1134_v21 = vld [vmem:[#allocation7 + $0x18] sm:$0xff] }
  0xf6   : > { %v3026_v29 = vpack.c.bf16 %v1134_v21, %v1133_v20  ;;  %v2641_v21 = vld [vmem:[%s716_s11] ss:$0 sm:$0xff] }
  0xf7   : > { %2989 = vmatpush3.bf16.msra.mxu1 %v2986_v42  ;;  %v1229_v42 = vld [vmem:[#allocation9 + $0x8] sm:$0xff] }
  0xf8   : > { %874 = vmatpush1.bf16.msra.mxu0 %v3209_v22  ;;  %2991 = vmatprep.subr.bf16.mxu1 %v2990_v45  ;;  %v3054_v43 = vpack.c.bf16 %v1229_v42, %v1228_v41 }
  0xf9   : > { %875 = vmatprep.subr.bf16.mxu0 %v3210_v23 }
  0xfb   : > { %2993 = vmatpush3.bf16.msra.mxu1 %v2990_v45  ;;  %v1142_v45 = vld [vmem:[#allocation7 + $0x58] sm:$0xff] }
  0xfc   : > { %876 = vmatpush1.bf16.msra.mxu0 %v3212_v25  ;;  %2995 = vmatprep.subr.bf16.mxu1 %v2994_v48  ;;  %v3042_v47 = vpack.c.bf16 %v1142_v45, %v1141_v44 }
  0xfd   : > { %877 = vmatprep.subr.bf16.mxu0 %v3213_v26 }
  0xff   : > { %2997 = vmatpush3.bf16.msra.mxu1 %v2994_v48  ;;  %v1231_v48 = vld [vmem:[#allocation9 + $0x18] sm:$0xff] }
 0x100   : > { %878 = vmatpush1.bf16.msra.mxu0 %v3215_v27  ;;  %2999 = vmatprep.subr.bf16.mxu1 %v2998_v51 }
 0x101   : > { %3007 = vmatprep.subr.bf16.mxu0 %v3006_v38 }
 0x103   : > { %3001 = vmatpush3.bf16.msra.mxu1 %v2998_v51  ;;  %v3058_v51 = vpack.c.bf16 %v1231_v48, %v1230_v46 }
 0x104   : > { %3003 = vmatprep.subr.bf16.mxu1 %v3002_v12 }
 0x107   : > { %3005 = vmatpush3.bf16.msra.mxu1 %v3002_v12 }
 0x108   : > { %3023 = vmatprep.subr.bf16.mxu1 %v3022_v18 }
 0x17a   : > { %v746_v52 = vpop.xlane.xlu0 %745 }
 0x17b   : > { %v750_v53 = vmul.f32 0.0078125, %v746_v52  ;;  %v3046_v52 = vpack.c.bf16 %v1144_v50, %v1143_v49 }
 0x17d   : > { %v752_v54 = vadd.f32 1e-06, %v750_v53  ;;  %v1232_v53 = vld [vmem:[#allocation9 + $0x20] sm:$0xff] }
 0x17e   : > { %v748_v55 = vpop.xlane.xlu0 %747 }
 0x17f   : > { %3288 = vrsqrt.f32 %v752_v54  ;;  %v751_v56 = vmul.f32 0.0078125, %v748_v55  ;;  %v1233_v54 = vld [vmem:[#allocation9 + $0x28] sm:$0xff]  ;;  %v1145_v55 = vld [vmem:[#allocation7 + $0x70] sm:$0xff] }
 0x181   : > { %v753_v57 = vadd.f32 1e-06, %v751_v56  ;;  %v3062_v56 = vpack.c.bf16 %v1233_v54, %v1232_v53 }
 0x183   : > { %3290 = vrsqrt.f32 %v753_v57  ;;  %v1146_v57 = vld [vmem:[#allocation7 + $0x78] sm:$0xff] }
 0x189   : > { %v3289_v58 = vpop.eup %3288 }
 0x18a   : > { %v756_v59 = vmul.f32 %v3289_v58, %v4038_v6  ;;  %v1234_v58 = vld [vmem:[#allocation9 + $0x30] sm:$0xff] }
 0x18c   : > { %v764_v1 = vmul.f32 %v2621_v61, %v756_v59  ;;  %v1235_v59 = vld [vmem:[#allocation9 + $0x38] sm:$0xff] }
 0x18d   : > { %v3291_v60 = vpop.eup %3290 }
 0x18e   : > { %v757_v62 = vmul.f32 %v3291_v60, %v4040_v8  ;;  %v3050_v60 = vpack.c.bf16 %v1146_v57, %v1145_v55 }
 0x190   : > { %v765_v2 = vmul.f32 %v2621_v61, %v757_v62  ;;  %v3066_v61 = vpack.c.bf16 %v1235_v59, %v1234_v58  ;;  %v1323_v58 = vlaneseq }
 0x192   : > { %v766_v3 = vpack.c.bf16 %v765_v2, %v764_v1  ;;  %v1324_v59 = vshrl.u32 %v1323_v58, 7 }
 0x194   : > { %896 = vmatmul.mubr.bf16.vlgmr.msra.gmra.mrb[0].mxu0 %v766_v3 }
 0x195   : > { %3009 = vmatpush3.bf16.msra.mxu0 %v3006_v38  ;;  %v1139_v38 = vld [vmem:[#allocation7 + $0x40] sm:$0xff] }
 0x196   : > { %3011 = vmatprep.subr.bf16.mxu0 %v3010_v4  ;;  %v3038_v40 = vpack.c.bf16 %v1140_v39, %v1139_v38 }
 0x199   : > { %3013 = vmatpush3.bf16.msra.mxu0 %v3010_v4 }
 0x19a   : > { %3015 = vmatprep.subr.bf16.mxu0 %v3014_v9 }
 0x19d   : > { %3017 = vmatpush3.bf16.msra.mxu0 %v3014_v9 }
 0x19e   : > { %3019 = vmatprep.subr.bf16.mxu0 %v3018_v15 }
 0x1a1   : > { %3021 = vmatpush3.bf16.msra.mxu0 %v3018_v15  ;;  %v2638_v15 = vld [vmem:[%s4435_s30] ss:$0 sm:$0xff]  ;;  %s3622_s30 = smov 32  }
 0x1a2   : > { %3055 = vmatprep.subr.bf16.mxu0 %v3054_v43 }
 0x267   : > { %v4094_v19 = vpop.f32.mrb[0].mxu0 }
 0x268   : > { %v4096_v22 = vpop.f32.mrb[1].mxu0  ;;  %v906_v23 = vmul.f32 %v4094_v19, %v4094_v19 }
 0x269   : > { %v1016_v25 = vmul.f32 %v4096_v22, %v4096_v22  ;;  %v4102_v26 = vpop.f32.mrb[2].mxu0 }
 0x26a   : > { %v907_v27 = vmul.f32 %v4102_v26, %v4102_v26  ;;  %v4106_v28 = vpop.f32.mrb[3].mxu0  ;;  %2854 = vmatprep.mubr.f32.mxu1 %v906_v23 }
 0x26b   : > { %v1017_v30 = vmul.f32 %v4106_v28, %v4106_v28  ;;  %v4112_v31 = vpack.c.bf16 %v4106_v28, %v4096_v22  ;;  %2873 = vmatprep.mubr.msk.f32.mxu0 %vm1026_vm0, %v1016_v25 }
 0x26c   : > { %2855 = vmatmul.mubr.f32.vlgmr.msra.gmra.mrb[0].mxu1 %v907_v27 }
 0x26d   : > { %2874 = vmatmul.mubr.msk.f32.vlgmr.msra.gmra.mrb[4].mxu0 %vm1026_vm0, %v1017_v30  ;;  %3025 = vmatpush3.bf16.msra.mxu1 %v3022_v18  ;;  %v1127_v30 = vld [vmem:[%s4438_s0] sm:$0xff] }
 0x26e   : > { %3027 = vmatprep.subr.bf16.mxu1 %v3026_v29  ;;  %3057 = vmatpush3.bf16.msra.mxu0 %v3054_v43 }
 0x26f   : > { %3059 = vmatprep.subr.bf16.mxu0 %v3058_v51 }
 0x271   : > { %3029 = vmatpush3.bf16.msra.mxu1 %v3026_v29 }
 0x272   : > { %3031 = vmatprep.subr.bf16.mxu1 %v3030_v34  ;;  %3061 = vmatpush3.bf16.msra.mxu0 %v3058_v51 }
 0x273   : > { %3063 = vmatprep.subr.bf16.mxu0 %v3062_v56 }
 0x275   : > { %3033 = vmatpush3.bf16.msra.mxu1 %v3030_v34 }
 0x276   : > { %3035 = vmatprep.subr.bf16.mxu1 %v3034_v37  ;;  %3065 = vmatpush3.bf16.msra.mxu0 %v3062_v56 }
 0x277   : > { %3067 = vmatprep.subr.bf16.mxu0 %v3066_v61 }
 0x279   : > { %3037 = vmatpush3.bf16.msra.mxu1 %v3034_v37 }
 0x27a   : > { %3039 = vmatprep.subr.bf16.mxu1 %v3038_v40  ;;  %3069 = vmatpush3.bf16.msra.mxu0 %v3066_v61  ;;  %v1325_v61 = vadd.s32 8, %v1324_v59 }
 0x27d   : > { %3041 = vmatpush3.bf16.msra.mxu1 %v3038_v40 }
 0x27e   : > { %3043 = vmatprep.subr.bf16.mxu1 %v3042_v47 }
 0x281   : > { %3045 = vmatpush3.bf16.msra.mxu1 %v3042_v47 }
 0x282   : > { %3047 = vmatprep.subr.bf16.mxu1 %v3046_v52 }
 0x285   : > { %3049 = vmatpush3.bf16.msra.mxu1 %v3046_v52 }
 0x286   : > { %3051 = vmatprep.subr.bf16.mxu1 %v3050_v60 }
 0x289   : > { %3053 = vmatpush3.bf16.msra.mxu1 %v3050_v60  ;;  %v1326_v60 = vadd.s32 16, %v1324_v59 }
 0x33f   : > { %v2856_v62 = vpop.f32.mrb[0].mxu1 }
 0x340   : > { %v1000_v63 = vmul.f32 0.03125, %v2856_v62  ;;  %v990_v0 = vpop.f32.mrb[1].mxu1  ;;  %v2875_v1 = vpop.f32.mrb[4].mxu0  ;;  %v1346_v62 = vand.u32 15, %v1326_v60 }
 0x341   : > { %v999_v2 = vmul.f32 0.03125, %v990_v0  ;;  %v1109_v3 = vmul.f32 0.03125, %v2875_v1  ;;  %v1099_v4 = vpop.f32.mrb[5].mxu0  ;;  %v1332_v0 = vand.u32 15, %v1324_v59  ;;  %v1327_v1 = vadd.s32 24, %v1324_v59 }
 0x342   : > { %v1002_v5 = vadd.f32 1e-06, %v1000_v63  ;;  %v1108_v7 = vmul.f32 0.03125, %v1099_v4  ;;  %v1377_v63 = vand.u32 127, %v1323_v58 }
 0x343   : > { %v1001_v9 = vadd.f32 1e-06, %v999_v2  ;;  %v1111_v10 = vadd.f32 1e-06, %v1109_v3  ;;  %v1339_v2 = vand.u32 15, %v1325_v61 }
 0x344   : > { %3292 = vrsqrt.f32 %v1002_v5  ;;  %v1110_v11 = vadd.f32 1e-06, %v1108_v7  ;;  %vm4152_vm2 = vcmp.le.s32.totalorder %v1377_v63, %v1346_v62  ;;  %vm4156_vm3 = vcmp.le.s32.totalorder %v1377_v63, %v1332_v0 }
 0x345   : > { %3294 = vrsqrt.f32 %v1001_v9  ;;  %v1353_v7 = vand.u32 15, %v1327_v1  ;;  %vm4162_vm5 = vcmp.le.s32.totalorder %v1377_v63, %v1339_v2 }
 0x346   : > { %3296 = vrsqrt.f32 %v1111_v10 }
 0x347   : > { %3298 = vrsqrt.f32 %v1110_v11  ;;  %vm4170_vm6 = vcmp.le.s32.totalorder %v1377_v63, %v1353_v7 }
 0x34e   : > { %v3293_v12 = vpop.eup %3292 }
 0x34f   : > { %v3295_v13 = vpop.eup %3294  ;;  %v1006_v14 = vmul.f32 %v3293_v12, %v4102_v26 }
 0x350   : > { %v3297_v16 = vpop.eup %3296  ;;  %v1005_v17 = vmul.f32 %v3295_v13, %v4094_v19  ;;  %v1126_v19 = vld [vmem:[%s4437_s16 + $0x8] sm:$0xff] }
 0x351   : > { %v3299_v18 = vpop.eup %3298  ;;  %v1115_v20 = vmul.f32 %v3297_v16, %v4106_v28  ;;  %v1015_v26 = vmul.f32 %v2638_v15, %v1006_v14  ;;  %v1128_v28 = vld [vmem:[%s4438_s0 + $0x8] sm:$0xff] }
 0x352   : > { %v1014_v23 = vmul.f32 %v2638_v15, %v1005_v17  ;;  %v1114_v25 = vmul.f32 %v3299_v18, %v4096_v22  ;;  %v1125_v22 = vld [vmem:[%s4437_s16] sm:$0xff] }
 0x353   : > { %v1124_v29 = vmul.f32 %v2641_v21, %v1115_v20  ;;  %v1130_v33 = vmul.f32 %v1126_v19, %v1015_v26 }
 0x354   : > { %2908 = vmatprep.mubr.f32.mxu1 %v1014_v23  ;;  %v1123_v27 = vmul.f32 %v2641_v21, %v1114_v25  ;;  %v1129_v36 = vmul.f32 %v1125_v22, %v1014_v23 }
 0x355   : > { %2909 = vmatmul.mubr.f32.vlgmr.msra.gmra.mrb[2].mxu1 %v1015_v26  ;;  %v1227_v40 = vmul.f32 %v1126_v19, %v1124_v29 }
 0x356   : > { %2927 = vmatprep.mubr.msk.f32.mxu0 %vm1026_vm0, %v1123_v27  ;;  %v1226_v44 = vmul.f32 %v1125_v22, %v1123_v27 }
 0x357   : > { %2928 = vmatmul.mubr.msk.f32.vlgmr.msra.gmra.mrb[6].mxu0 %vm1026_vm0, %v1124_v29 }
 0x428   : > { %v2910_v32 = vpop.f32.mrb[2].mxu1 }
 0x429   : > { %v1223_v34 = vmul.f32 %v2910_v32, %v1128_v28  ;;  %v1213_v35 = vpop.f32.mrb[3].mxu1 }
 0x42a   : > { %v1222_v37 = vmul.f32 %v1213_v35, %v1127_v30  ;;  %v2929_v38 = vpop.f32.mrb[6].mxu0 }
 0x42b   : > { %v1225_v39 = vadd.f32 %v1223_v34, %v1130_v33  ;;  %v1318_v41 = vmul.f32 %v2929_v38, %v1128_v28  ;;  %v1308_v42 = vpop.f32.mrb[7].mxu0 }
 0x42c   : > { %v1224_v43 = vadd.f32 %v1222_v37, %v1129_v36  ;;  %v1317_v45 = vmul.f32 %v1308_v42, %v1127_v30 }
 0x42d   : > { %v1322_v46 = vmul.f32 0.17677669, %v1225_v39  ;;  %v1320_v47 = vadd.f32 %v1318_v41, %v1227_v40 }
 0x42e   : > { %v1321_v48 = vmul.f32 0.17677669, %v1224_v43  ;;  %v1319_v49 = vadd.f32 %v1317_v45, %v1226_v44 }
 0x430   : > { %v1392_v50 = vpack.c.bf16 %v1322_v46, %v1321_v48  ;;  %v1382_v51 = vpack.c.bf16 %v1320_v47, %v1319_v49  ;;  %v3172_v52 = vpack.i.bf16 %v1322_v46, %v1321_v48 }
 0x432   : > { %3070 = vmatprep.subr.msk.bf16.mxu0 %vm1394_vm1, %v1382_v51  ;;  %3173 = vrot.lane.b32.xlu1 %v3172_v52, %s3620_s13  ;;  %v1402_v53 = vsel %vm1394_vm1, %v1382_v51, 0 }
 0x433   : > { %2931 = vmatpush3.bf16.xpose.msra.mxu0 %v1402_v53  ;;  %2932 = vmatprep.mubr.msk.bf16.mxu0 %vm1394_vm1, %v1392_v50 }
 0x4a4   : > { %v3174_v54 = vpop.permute.xlu1 %3173 }
 0x4a5   : > { %v3176_v55 = vunpack.i.h.bf16 %v3174_v54  ;;  %v3175_v56 = vunpack.i.l.bf16 %v3174_v54 }
 0x4a7   : > { %v4148_v57 = vpack.c.bf16 %v3176_v55, %v3175_v56 }
 0x4a9   : > { %2933 = vmatmul.mubr.msk.bf16.vlgmr.msra.gmra.mrb[8].mxu0 %vm1394_vm1, %v4148_v57 }
 0x57c   : > { %v2934_v5 = vpop.f32.mrb[8].mxu0 }
 0x57d   : > { %v1455_v9 = vsel %vm4152_vm2, %v2934_v5, -1e+30  ;;  %v1438_v10 = vpop.f32.mrb[9].mxu0 }
 0x57e   : > { %v1453_v12 = vsel %vm4156_vm3, %v1438_v10, -1e+30  ;;  %v2935_v13 = vpop.f32.mrb[10].mxu0  ;;  %v1464_v14 = vsel %vm1457_vm4, %v1455_v9, -inf }
 0x57f   : > { %1465 = vmax.xlane.f32.xlu0 %v1464_v14  ;;  %v1441_v15 = vpop.f32.mrb[11].mxu0  ;;  %v1458_v16 = vsel %vm1457_vm4, %v1453_v12, -inf  ;;  %v1456_v21 = vsel %vm4170_vm6, %v2935_v13, -1e+30 }
 0x580   : > { %v1454_v18 = vsel %vm4162_vm5, %v1441_v15, -1e+30  ;;  %1459 = vmax.xlane.f32.xlu1 %v1458_v16  ;;  %v1467_v23 = vsel %vm1457_vm4, %v1456_v21, -inf }
 0x581   : > { %v1461_v20 = vsel %vm1457_vm4, %v1454_v18, -inf }
 0x583   : > { %1462 = vmax.xlane.f32.xlu0 %v1461_v20 }
 0x587   : > { %1468 = vmax.xlane.f32.xlu0 %v1467_v23 }
 0x591   : > { %1570 = vrot.lane.b32.xlu1 %v1382_v51, %s3620_s13 }
 0x595   : > { %1565 = vrot.lane.b32.xlu1 %v1392_v50, %s3621_s9 }
 0x60c   : > { %v1466_v25 = vpop.xlane.xlu0 %1465 }
 0x60d   : > { %v1472_v26 = vsub.f32 %v1455_v9, %v1466_v25  ;;  %v1460_v27 = vpop.xlane.xlu1 %1459 }
 0x60e   : > { %v1470_v29 = vsub.f32 %v1453_v12, %v1460_v27 }
 0x60f   : > { %v1478_v19 = vmul.f32 1.442695, %v1472_v26 }
 0x610   : > { %v1474_v28 = vmul.f32 1.442695, %v1470_v29  ;;  %v1463_v22 = vpop.xlane.xlu0 %1462 }
 0x611   : > { %3300 = vpow2.f32 %v1478_v19  ;;  %v1471_v30 = vsub.f32 %v1454_v18, %v1463_v22  ;;  %v1571_v49 = vpop.permute.xlu1 %1570 }
 0x612   : > { %3302 = vpow2.f32 %v1474_v28  ;;  %v1579_v60 = vsel %vm1394_vm1, %v1571_v49, 0 }
 0x613   : > { %v1476_v34 = vmul.f32 1.442695, %v1471_v30 }
 0x614   : > { %v1469_v32 = vpop.xlane.xlu0 %1468 }
 0x615   : > { %v1473_v33 = vsub.f32 %v1456_v21, %v1469_v32  ;;  %v1566_v61 = vpop.permute.xlu1 %1565 }
 0x617   : > { %v1480_v35 = vmul.f32 1.442695, %v1473_v33 }
 0x619   : > { %3304 = vpow2.f32 %v1480_v35 }
 0x61a   : > { %3306 = vpow2.f32 %v1476_v34 }
 0x61b   : > { %v3301_v36 = vpop.eup %3300 }
 0x61c   : > { %v1488_v37 = vsel %vm1457_vm4, %v3301_v36, 0.0  ;;  %v3303_v38 = vpop.eup %3302 }
 0x61d   : > { %1489 = vadd.xlane.f32.xlu0 %v1488_v37  ;;  %v1482_v39 = vsel %vm1457_vm4, %v3303_v38, 0.0 }
 0x621   : > { %1483 = vadd.xlane.f32.xlu0 %v1482_v39 }
 0x623   : > { %v3305_v40 = vpop.eup %3304 }
 0x624   : > { %v1491_v41 = vsel %vm1457_vm4, %v3305_v40, 0.0  ;;  %v3307_v42 = vpop.eup %3306 }
 0x625   : > { %1492 = vadd.xlane.f32.xlu0 %v1491_v41  ;;  %v1485_v43 = vsel %vm1457_vm4, %v3307_v42, 0.0 }
 0x629   : > { %1486 = vadd.xlane.f32.xlu0 %v1485_v43 }
 0x63f   : > { %1505 = vrot.lane.b32.xlu0 %v4112_v31, %s3621_s9 }
 0x643   : > { %1567 = vrot.lane.b32.xlu0 %v4148_v57, %s3621_s9 }
 0x6aa   : > { %v1490_v44 = vpop.xlane.xlu0 %1489 }
 0x6ae   : > { %v1484_v45 = vpop.xlane.xlu0 %1483 }
 0x6b2   : > { %v1493_v46 = vpop.xlane.xlu0 %1492 }
 0x6b3   : > { %3308 = vrcp.f32 %v1493_v46 }
 0x6b4   : > { %3310 = vrcp.f32 %v1484_v45 }
 0x6b5   : > { %3312 = vrcp.f32 %v1490_v44 }
 0x6b6   : > { %v1487_v47 = vpop.xlane.xlu0 %1486 }
 0x6b7   : > { %3314 = vrcp.f32 %v1487_v47 }
 0x6ba   : > { %v1506_v48 = vpop.permute.xlu0 %1505 }
 0x6bb   : > { %2936 = vmatprep.subr.bf16.mxu1 %v1506_v48 }
 0x6bc   : > { %2937 = vmatpush3.bf16.msra.mxu1 %v1506_v48 }
 0x6bd   : > { %3071 = vmatprep.subr.msk.bf16.mxu1 %vm1394_vm1, %v1571_v49  ;;  %v3309_v50 = vpop.eup %3308 }
 0x6be   : > { %v3311_v51 = vpop.eup %3310  ;;  %v1501_v54 = vmul.f32 %v3309_v50, %v3305_v40  ;;  %v1568_v62 = vpop.permute.xlu0 %1567 }
 0x6bf   : > { %v3313_v52 = vpop.eup %3312  ;;  %v1498_v55 = vmul.f32 %v3311_v51, %v3303_v38 }
 0x6c0   : > { %v1500_v57 = vmul.f32 %v3313_v52, %v3301_v36 }
 0x6c1   : > { %v3315_v53 = vpop.eup %3314 }
 0x6c2   : > { %v1499_v56 = vmul.f32 %v3315_v53, %v3307_v42  ;;  %v1503_v59 = vpack.c.bf16 %v1501_v54, %v1500_v57  ;;  %v3216_v54 = vld [vmem:[%s3996_s20] sm:$0xff]   ;;  %v3218_v57 = vld [vmem:[%s3996_s20 + $0x10] sm:$0xff]  }
 0x6c4   : > { %v1502_v58 = vpack.c.bf16 %v1499_v56, %v1498_v55  ;;  %v3623_v55 = vmov 0.0   ;;  %v3217_v56 = vld [vmem:[%s3996_s20 + $0x8] sm:$0xff]  }
 0x6c6   : > { %2938 = vmatprep.mubr.msk.bf16.mxu1 %vm1457_vm4, %v1502_v58  ;;  %v3219_v58 = vld [vmem:[%s3996_s20 + $0x18] sm:$0xff]  }
 0x6c7   : > { %2939 = vmatmul.mubr.msk.bf16.vlgmr.msra.gmra.mrb[4].mxu1 %vm1457_vm4, %v1503_v59  ;;  %v3220_v59 = vld [vmem:[%s3996_s20 + $0x20] sm:$0xff]  }
 0x6c8   : > { %2943 = vmatpush3.bf16.xpose.msra.mxu1 %v1579_v60  ;;  %2944 = vmatprep.mubr.msk.bf16.mxu1 %vm1394_vm1, %v1566_v61  ;;  %v3221_v60 = vld [vmem:[%s3996_s20 + $0x28] sm:$0xff]   ;;  %v3222_v61 = vld [vmem:[%s3996_s20 + $0x30] sm:$0xff]  }
 0x6c9   : > { %2954 = vmatprep.subr.bf16.mxu1 %v3623_v55 }
 0x6cf   : > { %2945 = vmatmul.mubr.msk.bf16.vlgmr.msra.gmra.mrb[8].mxu1 %vm1394_vm1, %v1568_v62  ;;  %v3223_v62 = vld [vmem:[%s3996_s20 + $0x38] sm:$0xff]  }
 0x6d0   : > { %2955 = vmatpush3.bf16.msra.mxu1 %v3216_v54  ;;  %2970 = vmatprep.mubr.msk.bf16.mxu1 %vm3624_vm7, %v3623_v55  ;;  %v3265_v54 = vld [vmem:[%s4028_s7 + $0xcc] ss:$16 sps:$4 sm:$0xff]  }
 0x6d1   : > { %2956 = vmatprep.subr.bf16.mxu1 %v3623_v55 }
 0x6d4   : > { %2957 = vmatpush3.bf16.msra.mxu1 %v3217_v56  ;;  %v3263_v56 = vld [vmem:[%s4028_s7 + $0xc8] ss:$16 sps:$4 sm:$0xff]  }
 0x6d5   : > { %2958 = vmatprep.subr.bf16.mxu1 %v3623_v55 }
 0x6d8   : > { %2959 = vmatpush3.bf16.msra.mxu1 %v3218_v57  ;;  %v3268_v57 = vld [vmem:[%s4028_s7 + $0xe4] ss:$16 sps:$4 sm:$0xff]  }
 0x6d9   : > { %2960 = vmatprep.subr.bf16.mxu1 %v3623_v55 }
 0x6dc   : > { %2961 = vmatpush3.bf16.msra.mxu1 %v3219_v58  ;;  %v3271_v58 = vld [vmem:[%s4028_s7 + $0xec] ss:$16 sps:$4 sm:$0xff]  }
 0x6dd   : > { %2962 = vmatprep.subr.bf16.mxu1 %v3623_v55 }
 0x6e0   : > { %2963 = vmatpush3.bf16.msra.mxu1 %v3220_v59  ;;  %v3266_v59 = vld [vmem:[%s4028_s7 + $0xe0] ss:$16 sps:$4 sm:$0xff]  }
 0x6e1   : > { %2964 = vmatprep.subr.bf16.mxu1 %v3623_v55 }
 0x6e4   : > { %2965 = vmatpush3.bf16.msra.mxu1 %v3221_v60  ;;  %v3269_v60 = vld [vmem:[%s4028_s7 + $0xe8] ss:$16 sps:$4 sm:$0xff]  }
 0x6e5   : > { %2966 = vmatprep.subr.bf16.mxu1 %v3623_v55 }
 0x6e8   : > { %2967 = vmatpush3.bf16.msra.mxu1 %v3222_v61 }
 0x6e9   : > { %2968 = vmatprep.subr.bf16.mxu1 %v3623_v55  ;;  %v3260_v55 = vld [vmem:[%s4028_s7 + $0xc0] ss:$16 sps:$4 sm:$0xff]  }
 0x6ec   : > { %2969 = vmatpush3.bf16.msra.mxu1 %v3223_v62 }
 0x79a   : > { %v2940_v63 = vpop.f32.mrb[4].mxu1 }
 0x79b   : > { %v4196_v0 = vpop.f32.mrb[5].mxu1 }
 0x79c   : > { %v2941_v1 = vpop.f32.mrb[6].mxu1 }
 0x79d   : > { %v3177_v2 = vpack.i.bf16 %v2941_v1, %v2940_v63  ;;  %v4198_v5 = vpop.f32.mrb[7].mxu1 }
 0x7a2   : > { %v2946_v7 = vpop.f32.mrb[8].mxu1 }
 0x7a3   : > { %v1632_v9 = vsel %vm4152_vm2, %v2946_v7, -1e+30  ;;  %v1615_v10 = vpop.f32.mrb[9].mxu1 }
 0x7a4   : > { %v1630_v12 = vsel %vm4156_vm3, %v1615_v10, -1e+30  ;;  %v2947_v13 = vpop.f32.mrb[10].mxu1  ;;  %v1640_v14 = vsel %vm1457_vm4, %v1632_v9, -inf }
 0x7a5   : > { %1641 = vmax.xlane.f32.xlu0 %v1640_v14  ;;  %v1618_v15 = vpop.f32.mrb[11].mxu1  ;;  %v1634_v16 = vsel %vm1457_vm4, %v1630_v12, -inf  ;;  %v1633_v3 = vsel %vm4170_vm6, %v2947_v13, -1e+30 }
 0x7a6   : > { %v1631_v18 = vsel %vm4162_vm5, %v1618_v15, -1e+30  ;;  %1635 = vmax.xlane.f32.xlu1 %v1634_v16  ;;  %v1643_v4 = vsel %vm1457_vm4, %v1633_v3, -inf }
 0x7a7   : > { %v1637_v20 = vsel %vm1457_vm4, %v1631_v18, -inf }
 0x7a9   : > { %1638 = vmax.xlane.f32.xlu0 %v1637_v20 }
 0x7ad   : > { %1644 = vmax.xlane.f32.xlu0 %v1643_v4 }
 0x832   : > { %v1642_v21 = vpop.xlane.xlu0 %1641 }
 0x833   : > { %v1648_v23 = vsub.f32 %v1632_v9, %v1642_v21  ;;  %v1636_v25 = vpop.xlane.xlu1 %1635 }
 0x834   : > { %v1646_v26 = vsub.f32 %v1630_v12, %v1636_v25 }
 0x835   : > { %v1654_v27 = vmul.f32 1.442695, %v1648_v23 }
 0x836   : > { %v1650_v29 = vmul.f32 1.442695, %v1646_v26  ;;  %v1639_v19 = vpop.xlane.xlu0 %1638 }
 0x837   : > { %3316 = vpow2.f32 %v1654_v27  ;;  %v1647_v11 = vsub.f32 %v1631_v18, %v1639_v19 }
 0x838   : > { %3318 = vpow2.f32 %v1650_v29 }
 0x839   : > { %v1652_v28 = vmul.f32 1.442695, %v1647_v11  ;;  %v3226_v11 = vld [vmem:[%s4028_s7 + $0x4] ss:$16 sps:$4 sm:$0xff]  }
 0x83a   : > { %v1645_v22 = vpop.xlane.xlu0 %1644 }
 0x83b   : > { %3320 = vpow2.f32 %v1652_v28  ;;  %v1649_v30 = vsub.f32 %v1633_v3, %v1645_v22  ;;  %v3229_v28 = vld [vmem:[%s4028_s7 + $0xc] ss:$16 sps:$4 sm:$0xff]   ;;  %v3232_v22 = vld [vmem:[%s4028_s7 + $0x24] ss:$16 sps:$4 sm:$0xff]  }
 0x83c   : > { %2134 = vmatprep.subr.bf16.mxu1 %v3229_v28  ;;  %v3285_v28 = vld [vmem:[%s3998_s28 + $0x30] sm:$0xff]  }
 0x83d   : > { %v1656_v17 = vmul.f32 1.442695, %v1649_v30  ;;  %v3235_v30 = vld [vmem:[%s4028_s7 + $0x2c] ss:$16 sps:$4 sm:$0xff]  }
 0x83f   : > { %3322 = vpow2.f32 %v1656_v17  ;;  %v3230_v17 = vld [vmem:[%s4028_s7 + $0x20] ss:$16 sps:$4 sm:$0xff]  }
 0x841   : > { %v3317_v32 = vpop.eup %3316 }
 0x842   : > { %v1664_v33 = vsel %vm1457_vm4, %v3317_v32, 0.0  ;;  %v3319_v34 = vpop.eup %3318 }
 0x843   : > { %1665 = vadd.xlane.f32.xlu1 %v1664_v33  ;;  %v1658_v36 = vsel %vm1457_vm4, %v3319_v34, 0.0  ;;  %v3238_v33 = vld [vmem:[%s4028_s7 + $0x44] ss:$16 sps:$4 sm:$0xff]  }
 0x845   : > { %v3321_v35 = vpop.eup %3320 }
 0x846   : > { %v1661_v37 = vsel %vm1457_vm4, %v3321_v35, 0.0 }
 0x847   : > { %1659 = vadd.xlane.f32.xlu1 %v1658_v36  ;;  %1662 = vadd.xlane.f32.xlu0 %v1661_v37 }
 0x849   : > { %v3323_v38 = vpop.eup %3322 }
 0x84a   : > { %v1667_v39 = vsel %vm1457_vm4, %v3323_v38, 0.0 }
 0x84b   : > { %1668 = vadd.xlane.f32.xlu0 %v1667_v39 }
 0x858   : > { %1680 = vrot.lane.b32.xlu1 %v4112_v31, %s3622_s30 }
 0x861   : > { %3178 = vrot.lane.b32.xlu0 %v3177_v2, %s3622_s30 }
 0x8d0   : > { %v1666_v40 = vpop.xlane.xlu1 %1665 }
 0x8d4   : > { %v1660_v41 = vpop.xlane.xlu1 %1659  ;;  %v1663_v42 = vpop.xlane.xlu0 %1662 }
 0x8d5   : > { %3324 = vrcp.f32 %v1660_v41 }
 0x8d6   : > { %3326 = vrcp.f32 %v1663_v42 }
 0x8d7   : > { %3328 = vrcp.f32 %v1666_v40 }
 0x8d8   : > { %v1681_v43 = vpop.permute.xlu1 %1680  ;;  %v1669_v44 = vpop.xlane.xlu0 %1668 }
 0x8d9   : > { %3330 = vrcp.f32 %v1669_v44  ;;  %2948 = vmatprep.subr.bf16.mxu0 %v1681_v43  ;;  %v3247_v44 = vld [vmem:[%s4028_s7 + $0x6c] ss:$16 sps:$4 sm:$0xff]  }
 0x8da   : > { %2949 = vmatpush3.bf16.msra.mxu0 %v1681_v43  ;;  %v3244_v43 = vld [vmem:[%s4028_s7 + $0x64] ss:$16 sps:$4 sm:$0xff]  }
 0x8db   : > { %2091 = vmatprep.subr.bf16.mxu0 %v3226_v11  ;;  %v3283_v11 = vld [vmem:[%s3998_s28 + $0x28] sm:$0xff]  }
 0x8dc   : > { %v3179_v12 = vpop.permute.xlu0 %3178 }
 0x8dd   : > { %v3181_v14 = vunpack.i.h.bf16 %v3179_v12  ;;  %v3180_v15 = vunpack.i.l.bf16 %v3179_v12 }
 0x8df   : > { %v3325_v45 = vpop.eup %3324  ;;  %v1763_v3 = vsel %vm1394_vm1, %v4198_v5, %v3181_v14  ;;  %v1762_v4 = vsel %vm1394_vm1, %v4196_v0, %v3180_v15  ;;  %v3224_v5 = vld [vmem:[%s4028_s7] ss:$16 sps:$4 sm:$0xff]   ;;  %v3227_v0 = vld [vmem:[%s4028_s7 + $0x8] ss:$16 sps:$4 sm:$0xff]  }
 0x8e0   : > { %v3327_v46 = vpop.eup %3326  ;;  %v1674_v47 = vmul.f32 %v3325_v45, %v3319_v34  ;;  %v3241_v34 = vld [vmem:[%s4028_s7 + $0x4c] ss:$16 sps:$4 sm:$0xff]   ;;  %v3245_v45 = vld [vmem:[%s4028_s7 + $0x68] ss:$16 sps:$4 sm:$0xff]  }
 0x8e1   : > { %v3329_v48 = vpop.eup %3328  ;;  %v1675_v49 = vmul.f32 %v3327_v46, %v3321_v35  ;;  %v3239_v35 = vld [vmem:[%s4028_s7 + $0x48] ss:$16 sps:$4 sm:$0xff]   ;;  %v3248_v46 = vld [vmem:[%s4028_s7 + $0x80] ss:$16 sps:$4 sm:$0xff]  }
 0x8e2   : > { %v1676_v51 = vmul.f32 %v3329_v48, %v3317_v32  ;;  %v3233_v32 = vld [vmem:[%s4028_s7 + $0x28] ss:$16 sps:$4 sm:$0xff]  }
 0x8e3   : > { %v3331_v31 = vpop.eup %3330  ;;  %v1678_v50 = vpack.c.bf16 %v1675_v49, %v1674_v47  ;;  %v3250_v47 = vld [vmem:[%s4028_s7 + $0x84] ss:$16 sps:$4 sm:$0xff]   ;;  %v3251_v48 = vld [vmem:[%s4028_s7 + $0x88] ss:$16 sps:$4 sm:$0xff]   ;;  %v3253_v49 = vld [vmem:[%s4028_s7 + $0x8c] ss:$16 sps:$4 sm:$0xff]  }
 0x8e4   : > { %v1677_v52 = vmul.f32 %v3331_v31, %v3323_v38  ;;  %v3256_v31 = vld [vmem:[%s4028_s7 + $0xa4] ss:$16 sps:$4 sm:$0xff]  }
 0x8e5   : > { %2950 = vmatprep.mubr.msk.bf16.mxu0 %vm1457_vm4, %v1678_v50  ;;  %v3259_v50 = vld [vmem:[%s4028_s7 + $0xac] ss:$16 sps:$4 sm:$0xff]  }
 0x8e6   : > { %v1679_v53 = vpack.c.bf16 %v1677_v52, %v1676_v51  ;;  %v3254_v51 = vld [vmem:[%s4028_s7 + $0xa0] ss:$16 sps:$4 sm:$0xff]   ;;  %v3257_v52 = vld [vmem:[%s4028_s7 + $0xa8] ss:$16 sps:$4 sm:$0xff]  }
 0x8e8   : > { %2951 = vmatmul.mubr.msk.bf16.vlgmr.msra.gmra.mrb[12].mxu0 %vm1457_vm4, %v1679_v53  ;;  %v3262_v53 = vld [vmem:[%s4028_s7 + $0xc4] ss:$16 sps:$4 sm:$0xff]  }
 0x8e9   : > { %2123 = vmatprep.mubr.bf16.mxu0 %v3619_v24  ;;  %2092 = vmatpush1.bf16.msra.mxu0 %v3224_v5  ;;  %v3282_v5 = vld [vmem:[%s3998_s28 + $0x68] sm:$0xff]  }
 0x8ea   : > { %2093 = vmatprep.subr.bf16.mxu0 %v3232_v22  ;;  %v3286_v22 = vld [vmem:[%s3998_s28 + $0x78] sm:$0xff]  }
 0x8ed   : > { %2094 = vmatpush1.bf16.msra.mxu0 %v3230_v17 }
 0x8ee   : > { %2095 = vmatprep.subr.bf16.mxu0 %v3238_v33 }
 0x9bb   : > { %v2952_v63 = vpop.f32.mrb[12].mxu0 }
 0x9bc   : > { %v1723_v1 = vpop.f32.mrb[13].mxu0 }
 0x9bd   : > { %v2953_v2 = vpop.f32.mrb[14].mxu0 }
 0x9be   : > { %v3187_v7 = vpack.i.bf16 %v2953_v2, %v2952_v63  ;;  %v1726_v9 = vpop.f32.mrb[15].mxu0 }
 0x9bf   : > { %v3182_v10 = vpack.i.bf16 %v1726_v9, %v1723_v1 }
 0x9c1   : > { %3183 = vrot.lane.b32.xlu1 %v3182_v10, %s3621_s9 }
 0x9c5   : > { %3188 = vrot.lane.b32.xlu1 %v3187_v7, %s3620_s13 }
 0xa33   : > { %v3184_v13 = vpop.permute.xlu1 %3183 }
 0xa34   : > { %v3186_v16 = vunpack.i.h.bf16 %v3184_v13  ;;  %v3185_v18 = vunpack.i.l.bf16 %v3184_v13  ;;  %v2660_v13 = vld [vmem:[%s719_s27] ss:$0 sm:$0xff]  ;;  %s4448_s27 = sld [smem:[#allocation29_spill]] (!%p2713_p8) }
 0xa36   : > { %v1764_v25 = vsel %vm1026_vm0, %v1762_v4, %v3185_v18  ;;  %v1765_v26 = vsel %vm1026_vm0, %v1763_v3, %v3186_v16  ;;  %v3273_v3 = vld [vmem:[%s3998_s28] sm:$0xff]   ;;  %v3274_v4 = vld [vmem:[%s3998_s28 + $0x48] sm:$0xff]  }
 0xa37   : > { %v3189_v20 = vpop.permute.xlu1 %3188 }
 0xa38   : > { %v3191_v21 = vunpack.i.h.bf16 %v3189_v20  ;;  %v3190_v23 = vunpack.i.l.bf16 %v3189_v20  ;;  %v3272_v20 = vld [vmem:[%s3998_s28 + $0x40] sm:$0xff]  }
 0xa3a   : > { %v1767_v27 = vsel %vm1766_vm8, %v1764_v25, %v3190_v23  ;;  %v1768_v29 = vsel %vm1766_vm8, %v1765_v26, %v3191_v21  ;;  %v3275_v21 = vld [vmem:[%s3998_s28 + $0x8] sm:$0xff]   ;;  %v3276_v23 = vld [vmem:[%s3998_s28 + $0x50] sm:$0xff]   ;;  %v3278_v26 = vld [vmem:[%s3998_s28 + $0x58] sm:$0xff]  }
 0xa3b   : > { %v1769_v19 = vpack.c.bf16 %v1768_v29, %v1767_v27  ;;  %v3277_v25 = vld [vmem:[%s3998_s28 + $0x10] sm:$0xff]   ;;  %v3279_v27 = vld [vmem:[%s3998_s28 + $0x18] sm:$0xff]   ;;  %v3280_v29 = vld [vmem:[%s3998_s28 + $0x60] sm:$0xff]  }
 0xa3d   : > { %2971 = vmatmul.mubr.bf16.vlgmr.msra.gmra.mrb[12].mxu1 %v1769_v19  ;;  %v3281_v19 = vld [vmem:[%s3998_s28 + $0x20] sm:$0xff]  }
 0xa3e   : > { %2166 = vmatprep.mubr.bf16.mxu1 %v3619_v24  ;;  %2135 = vmatpush1.bf16.msra.mxu1 %v3227_v0  ;;  %v3236_v24 = vld [vmem:[%s4028_s7 + $0x40] ss:$16 sps:$4 sm:$0xff]  }
 0xa3f   : > { %2136 = vmatprep.subr.bf16.mxu1 %v3235_v30  ;;  %2096 = vmatpush1.bf16.msra.mxu0 %v3236_v24  ;;  %v3284_v0 = vld [vmem:[%s3998_s28 + $0x70] sm:$0xff]   ;;  %v3287_v30 = vld [vmem:[%s3998_s28 + $0x38] sm:$0xff]  }
 0xa40   : > { %2097 = vmatprep.subr.bf16.mxu0 %v3244_v43 }
 0xa42   : > { %2137 = vmatpush1.bf16.msra.mxu1 %v3233_v32 }
 0xa43   : > { %2138 = vmatprep.subr.bf16.mxu1 %v3241_v34 }
 0xa46   : > { %2139 = vmatpush1.bf16.msra.mxu1 %v3239_v35 }
 0xa47   : > { %2140 = vmatprep.subr.bf16.mxu1 %v3247_v44 }
 0xa4a   : > { %2141 = vmatpush1.bf16.msra.mxu1 %v3245_v45 }
 0xa4b   : > { %2142 = vmatprep.subr.bf16.mxu1 %v3253_v49 }
 0xa4e   : > { %2143 = vmatpush1.bf16.msra.mxu1 %v3251_v48 }
 0xa4f   : > { %2144 = vmatprep.subr.bf16.mxu1 %v3259_v50 }
 0xa52   : > { %2145 = vmatpush1.bf16.msra.mxu1 %v3257_v52 }
 0xa53   : > { %2146 = vmatprep.subr.bf16.mxu1 %v3265_v54 }
 0xa56   : > { %2147 = vmatpush1.bf16.msra.mxu1 %v3263_v56 }
 0xa57   : > { %2148 = vmatprep.subr.bf16.mxu1 %v3271_v58 }
 0xa5a   : > { %2149 = vmatpush1.bf16.msra.mxu1 %v3269_v60 }
 0xb10   : > { %v1869_v36 = vpop.f32.mrb[12].mxu1 }
 0xb11   : > { %v4250_v37 = vadd.f32 %v1869_v36, %v4038_v6  ;;  %v2972_v38 = vpop.f32.mrb[13].mxu1 }
 0xb12   : > { %v1872_v39 = vpop.f32.mrb[14].mxu1 }
 0xb13   : > { %2382 = vst [vmem:[#allocation3] sm:$0xff] %v4250_v37  ;;  %v4254_v40 = vadd.f32 %v1872_v39, %v4040_v8  ;;  %v2973_v41 = vpop.f32.mrb[15].mxu1  ;;  %v1876_v42 = vmul.f32 %v4250_v37, %v4250_v37  ;;  %v3242_v8 = vld [vmem:[%s4028_s7 + $0x60] ss:$16 sps:$4 sm:$0xff]  }
 0xb14   : > { %2098 = vmatpush1.bf16.msra.mxu0 %v3242_v8 }
 0xb15   : > { %2383 = vst [vmem:[#allocation3 + $0x8] sm:$0xff] %v4254_v40  ;;  %1878 = vadd.xlane.f32.xlu1 %v1876_v42  ;;  %v1877_v6 = vmul.f32 %v4254_v40, %v4254_v40  ;;  %2099 = vmatprep.subr.bf16.mxu0 %v3250_v47 }
 0xb17   : > { %1880 = vadd.xlane.f32.xlu0 %v1877_v6 }
 0xb18   : > { %2100 = vmatpush1.bf16.msra.mxu0 %v3248_v46 }
 0xb19   : > { %2101 = vmatprep.subr.bf16.mxu0 %v3256_v31 }
 0xb1c   : > { %2102 = vmatpush1.bf16.msra.mxu0 %v3254_v51 }
 0xb1d   : > { %2103 = vmatprep.subr.bf16.mxu0 %v3262_v53 }
 0xb20   : > { %2104 = vmatpush1.bf16.msra.mxu0 %v3260_v55 }
 0xb21   : > { %2105 = vmatprep.subr.bf16.mxu0 %v3268_v57 }
 0xb24   : > { %2106 = vmatpush1.bf16.msra.mxu0 %v3266_v59 }
 0xb25   : > { %2800 = vmatprep.subr.bf16.mxu0 %v3272_v20 }
 0xba2   : > { %v1879_v61 = vpop.xlane.xlu1 %1878 }
 0xba3   : > { %v1882_v62 = vmul.f32 0.0078125, %v1879_v61 }
 0xba4   : > { %v1881_v63 = vpop.xlane.xlu0 %1880 }
 0xba5   : > { %v1884_v1 = vadd.f32 1e-06, %v1882_v62  ;;  %v1883_v2 = vmul.f32 0.0078125, %v1881_v63 }
 0xba7   : > { %3332 = vrsqrt.f32 %v1884_v1  ;;  %v1885_v7 = vadd.f32 1e-06, %v1883_v2 }
 0xba9   : > { %3334 = vrsqrt.f32 %v1885_v7 }
 0xbb1   : > { %v3333_v9 = vpop.eup %3332 }
 0xbb2   : > { %v1888_v10 = vmul.f32 %v3333_v9, %v4250_v37 }
 0xbb3   : > { %v3335_v12 = vpop.eup %3334 }
 0xbb4   : > { %v1889_v14 = vmul.f32 %v3335_v12, %v4254_v40  ;;  %v1896_v15 = vmul.f32 %v2660_v13, %v1888_v10 }
 0xbb6   : > { %v1897_v16 = vmul.f32 %v2660_v13, %v1889_v14 }
 0xbb8   : > { %v1898_v18 = vpack.c.bf16 %v1897_v16, %v1896_v15 }
 0xbba   : > { %2124 = vmatmul.mubr.bf16.vlgmr.msra.gmra.mrb[16].mxu0 %v1898_v18  ;;  %2167 = vmatmul.mubr.bf16.vlgmr.msra.gmra.mrb[16].mxu1 %v1898_v18 }
 0xbbb   : > { %2801 = vmatpush3.bf16.msra.mxu0 %v3273_v3 }
 0xbbc   : > { %2802 = vmatprep.subr.bf16.mxu0 %v3274_v4 }
 0xbbf   : > { %2803 = vmatpush3.bf16.msra.mxu0 %v3275_v21 }
 0xbc0   : > { %2804 = vmatprep.subr.bf16.mxu0 %v3276_v23 }
 0xbc3   : > { %2805 = vmatpush3.bf16.msra.mxu0 %v3277_v25  ;;  %v2714_v25 = vld [vmem:[%s4448_s27] ss:$0 sm:$0xff] (!%p2713_p8) }
 0xbc4   : > { %2806 = vmatprep.subr.bf16.mxu0 %v3278_v26 }
 0xbc7   : > { %2807 = vmatpush3.bf16.msra.mxu0 %v3279_v27 }
 0xbc8   : > { %2808 = vmatprep.subr.bf16.mxu0 %v3280_v29 }
 0xbcb   : > { %2809 = vmatpush3.bf16.msra.mxu0 %v3281_v19 }
 0xbcc   : > { %2810 = vmatprep.subr.bf16.mxu0 %v3282_v5 }
 0xbcf   : > { %2811 = vmatpush3.bf16.msra.mxu0 %v3283_v11 }
 0xbd0   : > { %2812 = vmatprep.subr.bf16.mxu0 %v3284_v0 }
 0xbd3   : > { %2813 = vmatpush3.bf16.msra.mxu0 %v3285_v28 }
 0xbd4   : > { %2814 = vmatprep.subr.bf16.mxu0 %v3286_v22 }
 0xbd7   : > { %2815 = vmatpush3.bf16.msra.mxu0 %v3287_v30 }
 0xc8d   : > { %v2125_v17 = vpop.f32.mrb[16].mxu0  ;;  %v2168_v32 = vpop.f32.mrb[16].mxu1 }
 0xc8e   : > { %v2693_v33 = vmul.f32 -1.442695, %v2125_v17  ;;  %v2127_v34 = vpop.f32.mrb[17].mxu0  ;;  %v2170_v24 = vpop.f32.mrb[17].mxu1 }
 0xc8f   : > { %v2694_v35 = vmul.f32 -1.442695, %v2127_v34  ;;  %v2129_v36 = vpop.f32.mrb[18].mxu0  ;;  %v2172_v38 = vpop.f32.mrb[18].mxu1 }
 0xc90   : > { %3336 = vpow2.f32 %v2693_v33  ;;  %v2695_v39 = vmul.f32 -1.442695, %v2129_v36  ;;  %v2131_v41 = vpop.f32.mrb[19].mxu0  ;;  %v2174_v42 = vpop.f32.mrb[19].mxu1 }
 0xc91   : > { %3338 = vpow2.f32 %v2694_v35  ;;  %v2696_v6 = vmul.f32 -1.442695, %v2131_v41 }
 0xc92   : > { %3340 = vpow2.f32 %v2695_v39 }
 0xc93   : > { %3342 = vpow2.f32 %v2696_v6 }
 0xc9a   : > { %v3337_v43 = vpop.eup %3336 }
 0xc9b   : > { %v3339_v44 = vpop.eup %3338  ;;  %v2189_v8 = vadd.f32 1.0, %v3337_v43 }
 0xc9c   : > { %v3341_v45 = vpop.eup %3340  ;;  %v2190_v46 = vadd.f32 1.0, %v3339_v44 }
 0xc9d   : > { %v3343_v47 = vpop.eup %3342  ;;  %3344 = vrcp.f32 %v2189_v8  ;;  %v2191_v48 = vadd.f32 1.0, %v3341_v45 }
 0xc9e   : > { %3346 = vrcp.f32 %v2190_v46  ;;  %v2192_v49 = vadd.f32 1.0, %v3343_v47 }
 0xc9f   : > { %3348 = vrcp.f32 %v2191_v48 }
 0xca0   : > { %3350 = vrcp.f32 %v2192_v49 }
 0xca7   : > { %v3345_v31 = vpop.eup %3344 }
 0xca8   : > { %v3347_v50 = vpop.eup %3346  ;;  %v2201_v51 = vmul.f32 %v3345_v31, %v2125_v17 }
 0xca9   : > { %v3349_v52 = vpop.eup %3348  ;;  %v2202_v53 = vmul.f32 %v3347_v50, %v2127_v34 }
 0xcaa   : > { %v3351_v54 = vpop.eup %3350  ;;  %v2205_v55 = vmul.f32 %v2201_v51, %v2168_v32  ;;  %v2203_v56 = vmul.f32 %v3349_v52, %v2129_v36 }
 0xcab   : > { %v2206_v57 = vmul.f32 %v2202_v53, %v2170_v24  ;;  %v2204_v58 = vmul.f32 %v3351_v54, %v2131_v41 }
 0xcac   : > { %v2207_v59 = vmul.f32 %v2203_v56, %v2172_v38 }
 0xcad   : > { %v2208_v60 = vmul.f32 %v2204_v58, %v2174_v42 }
 0xcae   : > { %v2209_v61 = vpack.c.bf16 %v2207_v59, %v2205_v55 }
 0xcaf   : > { %v2210_v62 = vpack.c.bf16 %v2208_v60, %v2206_v57 }
 0xcb1   : > { %2371 = vmatprep.mubr.bf16.mxu0 %v2210_v62 }
 0xcb2   : > { %2372 = vmatmul.mubr.bf16.vlgmr.msra.gmra.mrb[20].mxu0 %v2209_v61 }
 0xd85   : > { %v2816_v63 = vpop.f32.mrb[20].mxu0  ;;  %2387 = sbr.rel (%p2713_p8) target bundleno = 3635 (0xe33), region = 116 }
 0xd86   : > { %v2817_v1 = vpop.f32.mrb[21].mxu0 }
 0xd87   : > { %v2818_v2 = vadd.f32 %v2817_v1, %v2816_v63  ;;  %v2819_v7 = vpop.f32.mrb[22].mxu0 }
 0xd88   : > { %v2820_v9 = vpop.f32.mrb[23].mxu0 }
 0xd89   : > { %2380 = vst [vmem:[#allocation2] sm:$0xff] %v2818_v2  ;;  %v2821_v10 = vadd.f32 %v2820_v9, %v2819_v7  ;;  %v2389_v12 = vadd.f32 (!%p2713_p8), %v2818_v2, %v4250_v37 }
 0xd8b   : > { %2381 = vst [vmem:[#allocation2 + $0x8] sm:$0xff] %v2821_v10  ;;  %v2390_v13 = vadd.f32 (!%p2713_p8), %v2821_v10, %v4254_v40  ;;  %v2391_v14 = vmul.f32 (!%p2713_p8), %v2389_v12, %v2389_v12 }
 0xd8d   : > { %2393 = vadd.xlane.f32.xlu0 %v2391_v14  ;;  %v2392_v15 = vmul.f32 %v2390_v13, %v2390_v13 }
 0xd91   : > { %2395 = vadd.xlane.f32.xlu0 %v2392_v15 }
 0xe1a   : > { %v2394_v16 = vpop.xlane.xlu0 %2393 }
 0xe1b   : > { %v2397_v18 = vmul.f32 0.0078125, %v2394_v16 }
 0xe1d   : > { %v2399_v20 = vadd.f32 1e-06, %v2397_v18 }
 0xe1e   : > { %v2396_v3 = vpop.xlane.xlu0 %2395 }
 0xe1f   : > { %3352 = vrsqrt.f32 %v2399_v20  ;;  %v2398_v4 = vmul.f32 0.0078125, %v2396_v3 }
 0xe21   : > { %v2400_v21 = vadd.f32 1e-06, %v2398_v4 }
 0xe23   : > { %3354 = vrsqrt.f32 %v2400_v21 }
 0xe29   : > { %v3353_v23 = vpop.eup %3352 }
 0xe2a   : > { %v2403_v37 = vmul.f32 %v3353_v23, %v2389_v12 }
 0xe2c   : > { %v2411_v26 = vmul.f32 %v2714_v25, %v2403_v37 }
 0xe2d   : > { %v3355_v40 = vpop.eup %3354 }
 0xe2e   : > { %2413 = vst [vmem:[#allocation15] sm:$0xff] %v2411_v26  ;;  %v2404_v27 = vmul.f32 %v3355_v40, %v2390_v13 }
 0xe30   : > { %v2412_v29 = vmul.f32 %v2714_v25, %v2404_v27 }
 0xe32   : > { %2414 = vst [vmem:[#allocation15 + $0x8] sm:$0xff] %v2412_v29 }
 0xe33 PF: > { %p3121_p12 = scmp.eq.s32.totalorder %s3732_s25, 1  ;;  %s3625_s4 = smov [#allocation15]  }
 0xe34   : > { %s2421_s17 = sshll.u32 %s3625_s4, 4  ;;  %s2422_s17 = int_to_ptr.vmem [resolvable:$true] %s2421_s17 }
 0xe35   : > { %s3530_s18 = scalar_lea.vmem %s2422_s17, 256  ;;  %p3537_p5 = scmp.lt.s32.totalorder %s2422_s17, %s2422_s17 }
 0xe36   : > { %p3531_p6 = scmp.ne.s32.totalorder %s2422_s17, %s3530_s18  ;;  %p3538_p1 = scmp.lt.s32.totalorder %s3530_s18, %s3530_s18 }
 0xe38   : > { %p3532_p7 = pnand %p3531_p6, %p3121_p12  ;;  %p3539_p11 = por %p3538_p1, %p3537_p5 }
 0xe3a   : > { %p3533_p4 = pneg %p3532_p7 }
 0xe3c   : > { %p3540_p9 = pnand %p3539_p11, %p3533_p4 }
 0xe3e   : > { %3543 = shalt.err (!%p3540_p9)
}
 0xe3f   : > { %s4449_s1 = sld [smem:[#allocation34_spill]] }
 0xe45   : > { %s3544_s11 = scalar_lea.hbm %s4449_s1, 256 }
 0xe46   : > { %p3545_p13 = scmp.ne.s32.totalorder %s4449_s1, %s3544_s11  ;;  %p3550_p3 = scmp.lt.u32.totalorder %s3544_s11, %s4449_s1 }
 0xe48   : > { %p3546_p2 = pnand %p3545_p13, %p3121_p12 }
 0xe4a   : > { %p3547_p0 = pneg %p3546_p2 }
 0xe4c   : > { %p3552_p10 = pnand %p3550_p3, %p3547_p0 }
 0xe4e   : > { %3555 = shalt.err (!%p3552_p10)
}
 0xe4f   : > { %s3626_s9 = smov 128   ;;  %s3627_s30 = smov 8  }
 0xe50   : > { %3091 = dma.vmem_to_hbm [thread:$0]  (%p3121_p12), %s2422_s17, 256, %s4449_s1, [#allocation6], %s3626_s9, %s3626_s9, %s3627_s30  }
 0xe51   : > { %3589 = dma.done.wait (%p3121_p12), [#allocation6], 256  }
 0xe52   : > { %3591 = vsyncadd (%p3121_p12), [#allocation6], 4294967040 }
 0xe53 PF: > { %s4450_s24 = sld [smem:[#allocation22_spill]]  ;;  %s4451_s23 = sld [smem:[#allocation21_spill]] }
 0xe54   : > { %s4452_s28 = sld [smem:[#allocation23_spill]]  ;;  %s4453_s21 = smov %s3598_s22 }
 0xe59   : > { %p32_p8 = scmp.ge.s32.totalorder %s4450_s24, 4   ;;  %s4454_s22 = smov %s4451_s23 }
 0xe5a   : > { %s4455_s23 = smov %s4452_s28 }
 0xe5b   :  { %34 = sbr.rel (!%p32_p8) target bundleno = 20 (0x14), region = 181 }
 0xe62   :  { %2437 = vsyncpa [#allocation5], 1 }
 0xe63   :  { %2439 = vsyncpa [#allocation5 + $0x1], 1 }
 0xe64   :  { %2440 = vsyncpa [#allocation8], 1 }
 0xe65   :  { %2441 = vsyncpa [#allocation11], 1 }
 0xe66   :  { %2443 = vsyncpa [#allocation11 + $0x1], 1 }
 0xe67   :  { %2444 = vsyncpa [#allocation14], 1 }
 0xe68   :  { %2446 = vsyncpa [#allocation14 + $0x1], 1 }
 0xe69   :  { %2447 = vsyncpa [#allocation6], 1 }
 0xe6a   :  { %2449 = vsyncpa [#allocation6 + $0x1], 1 }

</bundles_post_ra>
